<compile_context>
chip_gen: v7x
topology: tpu7x:2x2x1
jax: 0.10.0
libtpu: 0.0.40
codegen_flags: <defaults>
</compile_context>

<pallas_src>
import functools

import jax
import jax.numpy as jnp
from jax.experimental import pallas as pl
from jax.experimental.pallas import tpu as pltpu


# ----------------------------- Pallas kernel ------------------------------ #
def _moe_expert_kernel(sorted_gate_ref,        # SMEM (B,) int32  routed expert per *sorted* sentence
                       order_ref,              # SMEM (B,) int32  sorted->original sentence permutation
                       x_ref,                  # VMEM (1, TS, D)  bf16 tokens of sentence order[b], tile t
                       w1_ref,                 # VMEM (1, D, F)   bf16 routed expert's first weight
                       b1_ref,                 # VMEM (1, 1, F)   f32  routed expert's first bias
                       w2_ref,                 # VMEM (1, F, D)   bf16 routed expert's second weight
                       b2_ref,                 # VMEM (1, 1, D)   f32  routed expert's second bias
                       cw_ref,                 # SMEM (B,)        f32  combine weight, sorted order
                       out_ref):               # VMEM (1, TS, D)  f32  output tile (original position)
    del sorted_gate_ref, order_ref  # only consumed by the BlockSpec index_maps
    b = pl.program_id(0)
    w = cw_ref[b]                               # scalar combine weight (topk=1, raw_prob)

    xt = x_ref[0]                               # (TS, D) bf16 MXU operand (pre-cast in wrapper)
    h = jnp.dot(xt, w1_ref[0], preferred_element_type=jnp.float32)   # (TS, F) f32
    h = h + b1_ref[0]
    # tanh-approx GELU (EUP); matches nn.GELU(approximate='tanh') to ~1e-3.
    h = jax.nn.gelu(h)
    y = jnp.dot(h.astype(jnp.bfloat16), w2_ref[0],
                preferred_element_type=jnp.float32)                  # (TS, D) f32
    y = y + b2_ref[0]

    out_ref[0] = (w * y).astype(out_ref.dtype)


# ------------------------- tiling / VMEM budgeting ------------------------- #
def _kernel_vmem_bytes(TS, D, F, w_bufs):
    w = w_bufs * (D * F * 2 + F * D * 2)     # bf16 expert weights (w1 + w2)
    bia = 2 * (F * 4 + D * 4)                # f32 biases, double-buffered
    xio = 2 * TS * D * 2 + 2 * TS * D * 4    # bf16 x tile + f32 out tile, double-buffered
    h = TS * F * 4 + TS * F * 2              # (TS, F) f32 intermediate + bf16 copy
    return w + bia + xio + h


def _pick_seq_tile(S, D, F, w_bufs, target_bytes):
    cands = [c for c in (1024, 512, 256, 128, 64, 32, 16, 8) if S % c == 0]
    if not cands:
        return S                              # small / odd sequence: full extent
    for c in cands:                           # largest tile that fits the VMEM target
        if _kernel_vmem_bytes(c, D, F, w_bufs) <= target_bytes:
            return c
    return cands[-1]


def _moe_experts_select(x_bf16, w1, b1, w2, b2, sorted_gate, order, cw_sorted,
                        out_dtype):
    """x_bf16: [B, S, D] bf16; w1: [E, D, F] bf16; b1: [E, 1, F] f32;
    w2: [E, F, D] bf16; b2: [E, 1, D] f32; sorted_gate/order: [B] int32
    (sentences sorted by routed expert); cw_sorted: [B] f32 combine weights in
    sorted order.  Returns [B, S, D] out_dtype in the ORIGINAL sentence order."""
    B, S, D = x_bf16.shape
    E, _, F = w1.shape

    # Single-buffer the (large) expert weights; they change only at expert
    # boundaries and expert-sorted sentences amortize the exposed DMA.
    w_block_bytes = 2 * (D * F * 2)           # w1 + w2 bf16, one buffer
    w_bufs = 1 if w_block_bytes > (16 << 20) else 2

    TS = _pick_seq_tile(S, D, F, w_bufs, target_bytes=48 << 20)
    n_t = S // TS if S % TS == 0 else 1
    if S % TS != 0:
        TS = S

    est = _kernel_vmem_bytes(TS, D, F, w_bufs)
    vmem_limit = min(max(int(est * 1.25) + (4 << 20), 32 << 20), 96 << 20)

    w_kw = {"pipeline_mode": pl.Buffered(1)} if w_bufs == 1 else {}

    dims = ("parallel", "arbitrary") if B >= 2 else ("arbitrary", "parallel")

    return pl.pallas_call(
        _moe_expert_kernel,
        out_shape=jax.ShapeDtypeStruct((B, S, D), out_dtype),
        grid_spec=pltpu.PrefetchScalarGridSpec(
            num_scalar_prefetch=2,             # sorted_gate, order -> SMEM, feed index_maps
            grid=(B, n_t),
            in_specs=[
                # x tile of sentence order[b]
                pl.BlockSpec((1, TS, D), lambda b, t, sg, od: (od[b], t, 0)),
                # routed expert's weights/biases (same block across t -> DMA dedup)
                pl.BlockSpec((1, D, F), lambda b, t, sg, od: (sg[b], 0, 0), **w_kw),
                pl.BlockSpec((1, 1, F), lambda b, t, sg, od: (sg[b], 0, 0)),
                pl.BlockSpec((1, F, D), lambda b, t, sg, od: (sg[b], 0, 0), **w_kw),
                pl.BlockSpec((1, 1, D), lambda b, t, sg, od: (sg[b], 0, 0)),
                # per-sentence combine weights (sorted order), scalar reads
                pl.BlockSpec(memory_space=pltpu.MemorySpace.SMEM),
            ],
            out_specs=pl.BlockSpec((1, TS, D), lambda b, t, sg, od: (od[b], t, 0)),
        ),
        compiler_params=pltpu.CompilerParams(
            dimension_semantics=dims,
            vmem_limit_bytes=vmem_limit),
    )(sorted_gate, order, x_bf16, w1, b1, w2, b2, cw_sorted)


# ------------------------------ JAX wrapper -------------------------------- #
def moe_layer_forward(x, attention_mask, params, *, topk=1,
                      use_balance_loss=True):
    """Mirrors MoELayer.forward with route_method='gate-sentence',
    weight_type='raw_prob'. Returns (out, aux_loss, combine_tensor)."""
    del attention_mask  # PyTorch code overwrites it with ones anyway
    if topk != 1:
        # TODO(synk): topk>1 sentence routing (multi-expert accumulation) is not
        # implemented in the Pallas hot path; reference config uses topk=1.
        raise NotImplementedError("Pallas MoE kernel implements topk=1 routing.")

    B, S, D = x.shape
    E = params["gate_w"].shape[0]

    # ---- router (glue; tiny) ----
    x_avg = jnp.mean(x, axis=1)                                        # [B, D]
    logits_gate = x_avg @ params["gate_w"].T                           # [B, E]
    prob_gate = jax.nn.softmax(logits_gate, axis=-1)                   # [B, E]
    topk_vals, gate_idx = jax.lax.top_k(prob_gate, topk)               # [B, 1]
    expert_mask = jax.nn.one_hot(gate_idx, E, dtype=prob_gate.dtype)   # [B, 1, E]
    combine = jnp.sum(topk_vals[..., None] * expert_mask, axis=1)      # [B, E]

    # balance loss
    if use_balance_loss:
        num_sent = (expert_mask.sum(axis=1) > 0).sum(axis=0).astype(jnp.float32)
        P = prob_gate.mean(axis=0)
        f = num_sent / jnp.sum(num_sent)
        balance_loss = E * jnp.sum(P * f)
    else:
        balance_loss = 0.0
    # importance loss (torch.std is unbiased -> ddof=1)
    importance = jnp.sum(prob_gate, axis=0)
    importance_loss = (jnp.std(importance, ddof=1) / jnp.mean(importance)) ** 2

    # ---- group sentences by routed expert so Pallas dedups weight DMAs ----
    gate_sel = gate_idx[:, 0].astype(jnp.int32)                        # [B]
    order = jnp.argsort(gate_sel).astype(jnp.int32)                    # [B] sorted -> original
    sorted_gate = jnp.take(gate_sel, order)                            # [B]
    cw_sorted = jnp.take(topk_vals[:, 0].astype(jnp.float32), order)   # [B]

    # ---- routed expert FFN + combine (Pallas hot path) ----
    # Expert weights are already bf16 (cast hoisted out of the forward).
    out = _moe_experts_select(
        x.astype(jnp.bfloat16),     # bf16 activations (producer would emit bf16 in a real model)
        params["w1"], params["b1"], params["w2"], params["b2"],
        sorted_gate, order, cw_sorted,
        out_dtype=x.dtype,
    )

    return out, balance_loss + importance_loss, combine


# ------------------------------ param init --------------------------------- #
def init_params(key, hidden, ffn, num_experts):
    """Expert weights are stored bf16 once here (cast hoisted out of the
    per-call forward); gate / biases stay f32."""
    ks = jax.random.split(key, 5)
    scale1 = 1.0 / jnp.sqrt(hidden)
    scale2 = 1.0 / jnp.sqrt(ffn)
    return {
        "gate_w": jax.random.normal(ks[0], (num_experts, hidden), jnp.float32) * scale1,
        "w1": (jax.random.normal(ks[1], (num_experts, hidden, ffn), jnp.float32)
               * scale1).astype(jnp.bfloat16),
        "b1": jax.random.normal(ks[2], (num_experts, 1, ffn), jnp.float32) * 0.01,
        "w2": (jax.random.normal(ks[3], (num_experts, ffn, hidden), jnp.float32)
               * scale2).astype(jnp.bfloat16),
        "b2": jax.random.normal(ks[4], (num_experts, 1, hidden), jnp.float32) * 0.01,
    }


if __name__ == "__main__":
    # Small but lane-aligned shapes (D, FFN multiples of 128 -> unmasked vst).
    B, S, D = 4, 8, 128      # batch, seq, hidden
    FFN = 4 * D              # expert intermediate size (=512)
    E = 4                    # num_experts
    key = jax.random.PRNGKey(0)
    k_x, k_p = jax.random.split(key)

    x = jax.random.normal(k_x, (B, S, D), jnp.float32)
    attention_mask = jnp.ones((B, S), jnp.float32)
    params = init_params(k_p, D, FFN, E)

    fwd = jax.jit(functools.partial(moe_layer_forward, topk=1,
                                    use_balance_loss=True))
    out, aux_loss, combine = fwd(x, attention_mask, params)
    jax.block_until_ready((out, aux_loss, combine))

    assert out.shape == (B, S, D)
    assert combine.shape == (B, E)
    assert jnp.isfinite(out).all()
    print("KERNEL_OK")
</pallas_src>

<mosaic_0001>
module attributes {stable_mosaic.version = 11 : i64} {
  func.func @_moe_expert_kernel(%arg0: i32, %arg1: i32, %arg2: memref<4xi32, #tpu.memory_space<smem>>, %arg3: memref<4xi32, #tpu.memory_space<smem>>, %arg4: memref<1x8x128xbf16, #tpu.memory_space<vmem>>, %arg5: memref<1x128x512xbf16, #tpu.memory_space<vmem>>, %arg6: memref<1x1x512xf32, #tpu.memory_space<vmem>>, %arg7: memref<1x512x128xbf16, #tpu.memory_space<vmem>>, %arg8: memref<1x1x128xf32, #tpu.memory_space<vmem>>, %arg9: memref<4xf32, #tpu.memory_space<smem>>, %arg10: memref<1x8x128xf32, #tpu.memory_space<vmem>>) attributes {dimension_semantics = [#tpu.dimension_semantics<parallel>, #tpu.dimension_semantics<arbitrary>], iteration_bounds = array<i64: 4, 1>, scalar_prefetch = 2 : i64, scratch_operands = 0 : i64, tpu.core_type = #tpu.core_type<tc>, window_params = [{transform_indices = @transform_0, window_bounds = array<i64: 1, 8, 128>}, {transform_indices = @transform_1, window_bounds = array<i64: 1, 128, 512>}, {transform_indices = @transform_2, window_bounds = array<i64: 1, 1, 512>}, {transform_indices = @transform_3, window_bounds = array<i64: 1, 512, 128>}, {transform_indices = @transform_4, window_bounds = array<i64: 1, 1, 128>}, {transform_indices = @transform_5, window_bounds = array<i64: 4>}, {transform_indices = @transform_6, window_bounds = array<i64: 1, 8, 128>}]} {
    %0 = arith.index_cast %arg0 : i32 to index
    %1 = memref.load %arg9[%0] : memref<4xf32, #tpu.memory_space<smem>>
    %c0 = arith.constant 0 : index
    %c0_0 = arith.constant 0 : index
    %c0_1 = arith.constant 0 : index
    %2 = vector.load %arg4[%c0, %c0_0, %c0_1] : memref<1x8x128xbf16, #tpu.memory_space<vmem>>, vector<1x8x128xbf16>
    %3 = vector.shape_cast %2 : vector<1x8x128xbf16> to vector<8x128xbf16>
    %c0_2 = arith.constant 0 : index
    %c0_3 = arith.constant 0 : index
    %c0_4 = arith.constant 0 : index
    %4 = vector.load %arg5[%c0_2, %c0_3, %c0_4] : memref<1x128x512xbf16, #tpu.memory_space<vmem>>, vector<1x128x512xbf16>
    %5 = vector.shape_cast %4 : vector<1x128x512xbf16> to vector<128x512xbf16>
    %cst = arith.constant dense<0.000000e+00> : vector<8x512xf32>
    %6 = tpu.matmul %3, %5, %cst {dimension_numbers = #tpu.dot_dimension_numbers<[1], [0], [0], [1], [0, 0, 1, 1], [], []>} : vector<8x128xbf16>, vector<128x512xbf16>, vector<8x512xf32> -> vector<8x512xf32>
    %c0_5 = arith.constant 0 : index
    %c0_6 = arith.constant 0 : index
    %c0_7 = arith.constant 0 : index
    %7 = vector.load %arg6[%c0_5, %c0_6, %c0_7] : memref<1x1x512xf32, #tpu.memory_space<vmem>>, vector<1x1x512xf32>
    %8 = vector.shape_cast %7 : vector<1x1x512xf32> to vector<1x512xf32>
    %9 = vector.broadcast %8 : vector<1x512xf32> to vector<8x512xf32>
    %10 = arith.addf %6, %9 : vector<8x512xf32>
    %11 = arith.mulf %10, %10 : vector<8x512xf32>
    %12 = arith.mulf %10, %11 : vector<8x512xf32>
    %cst_8 = arith.constant 4.471500e-02 : f32
    %13 = vector.broadcast %cst_8 : f32 to vector<8x512xf32>
    %14 = arith.mulf %13, %12 : vector<8x512xf32>
    %15 = arith.addf %10, %14 : vector<8x512xf32>
    %cst_9 = arith.constant 0.797884583 : f32
    %16 = vector.broadcast %cst_9 : f32 to vector<8x512xf32>
    %17 = arith.mulf %16, %15 : vector<8x512xf32>
    %18 = math.tanh %17 : vector<8x512xf32>
    %cst_10 = arith.constant 1.000000e+00 : f32
    %19 = vector.broadcast %cst_10 : f32 to vector<8x512xf32>
    %20 = arith.addf %19, %18 : vector<8x512xf32>
    %cst_11 = arith.constant 5.000000e-01 : f32
    %21 = vector.broadcast %cst_11 : f32 to vector<8x512xf32>
    %22 = arith.mulf %21, %20 : vector<8x512xf32>
    %23 = arith.mulf %10, %22 : vector<8x512xf32>
    %24 = arith.truncf %23 : vector<8x512xf32> to vector<8x512xbf16>
    %c0_12 = arith.constant 0 : index
    %c0_13 = arith.constant 0 : index
    %c0_14 = arith.constant 0 : index
    %25 = vector.load %arg7[%c0_12, %c0_13, %c0_14] : memref<1x512x128xbf16, #tpu.memory_space<vmem>>, vector<1x512x128xbf16>
    %26 = vector.shape_cast %25 : vector<1x512x128xbf16> to vector<512x128xbf16>
    %cst_15 = arith.constant dense<0.000000e+00> : vector<8x128xf32>
    %27 = tpu.matmul %24, %26, %cst_15 {dimension_numbers = #tpu.dot_dimension_numbers<[1], [0], [0], [1], [0, 0, 1, 1], [], []>} : vector<8x512xbf16>, vector<512x128xbf16>, vector<8x128xf32> -> vector<8x128xf32>
    %c0_16 = arith.constant 0 : index
    %c0_17 = arith.constant 0 : index
    %c0_18 = arith.constant 0 : index
    %28 = vector.load %arg8[%c0_16, %c0_17, %c0_18] : memref<1x1x128xf32, #tpu.memory_space<vmem>>, vector<1x1x128xf32>
    %29 = vector.shape_cast %28 : vector<1x1x128xf32> to vector<1x128xf32>
    %30 = vector.broadcast %29 : vector<1x128xf32> to vector<8x128xf32>
    %31 = arith.addf %27, %30 : vector<8x128xf32>
    %32 = vector.broadcast %1 : f32 to vector<8x128xf32>
    %33 = arith.mulf %32, %31 : vector<8x128xf32>
    %c0_19 = arith.constant 0 : index
    %c0_20 = arith.constant 0 : index
    %c0_21 = arith.constant 0 : index
    %34 = vector.load %arg10[%c0_19, %c0_20, %c0_21] : memref<1x8x128xf32, #tpu.memory_space<vmem>>, vector<1x8x128xf32>
    %35 = vector.shape_cast %34 : vector<1x8x128xf32> to vector<8x128xf32>
    %36 = vector.shape_cast %33 : vector<8x128xf32> to vector<1x8x128xf32>
    tpu.vector_store %arg10[%c0_19, %c0_20, %c0_21], %36 {strides = array<i32>} : memref<1x8x128xf32, #tpu.memory_space<vmem>>, vector<1x8x128xf32>,
    return
  }
  func.func @transform_0(%arg0: i32, %arg1: i32, %arg2: memref<4xi32, #tpu.memory_space<smem>>, %arg3: memref<4xi32, #tpu.memory_space<smem>>) -> (i32, i32, i32) {
    %0 = arith.index_cast %arg0 : i32 to index
    %1 = memref.load %arg3[%0] : memref<4xi32, #tpu.memory_space<smem>>
    %c0_i32 = arith.constant 0 : i32
    %c0_i32_0 = arith.constant 0 : i32
    return %1, %arg1, %c0_i32 : i32, i32, i32
  }
  func.func @transform_1(%arg0: i32, %arg1: i32, %arg2: memref<4xi32, #tpu.memory_space<smem>>, %arg3: memref<4xi32, #tpu.memory_space<smem>>) -> (i32, i32, i32) {
    %0 = arith.index_cast %arg0 : i32 to index
    %1 = memref.load %arg2[%0] : memref<4xi32, #tpu.memory_space<smem>>
    %c0_i32 = arith.constant 0 : i32
    %c0_i32_0 = arith.constant 0 : i32
    %c0_i32_1 = arith.constant 0 : i32
    return %1, %c0_i32, %c0_i32_0 : i32, i32, i32
  }
  func.func @transform_2(%arg0: i32, %arg1: i32, %arg2: memref<4xi32, #tpu.memory_space<smem>>, %arg3: memref<4xi32, #tpu.memory_space<smem>>) -> (i32, i32, i32) {
    %0 = arith.index_cast %arg0 : i32 to index
    %1 = memref.load %arg2[%0] : memref<4xi32, #tpu.memory_space<smem>>
    %c0_i32 = arith.constant 0 : i32
    %c0_i32_0 = arith.constant 0 : i32
    %c0_i32_1 = arith.constant 0 : i32
    return %1, %c0_i32, %c0_i32_0 : i32, i32, i32
  }
  func.func @transform_3(%arg0: i32, %arg1: i32, %arg2: memref<4xi32, #tpu.memory_space<smem>>, %arg3: memref<4xi32, #tpu.memory_space<smem>>) -> (i32, i32, i32) {
    %0 = arith.index_cast %arg0 : i32 to index
    %1 = memref.load %arg2[%0] : memref<4xi32, #tpu.memory_space<smem>>
    %c0_i32 = arith.constant 0 : i32
    %c0_i32_0 = arith.constant 0 : i32
    %c0_i32_1 = arith.constant 0 : i32
    return %1, %c0_i32, %c0_i32_0 : i32, i32, i32
  }
  func.func @transform_4(%arg0: i32, %arg1: i32, %arg2: memref<4xi32, #tpu.memory_space<smem>>, %arg3: memref<4xi32, #tpu.memory_space<smem>>) -> (i32, i32, i32) {
    %0 = arith.index_cast %arg0 : i32 to index
    %1 = memref.load %arg2[%0] : memref<4xi32, #tpu.memory_space<smem>>
    %c0_i32 = arith.constant 0 : i32
    %c0_i32_0 = arith.constant 0 : i32
    %c0_i32_1 = arith.constant 0 : i32
    return %1, %c0_i32, %c0_i32_0 : i32, i32, i32
  }
  func.func @transform_5(%arg0: i32, %arg1: i32, %arg2: memref<4xi32, #tpu.memory_space<smem>>, %arg3: memref<4xi32, #tpu.memory_space<smem>>) -> i32 {
    %c0_i32 = arith.constant 0 : i32
    %c0_i32_0 = arith.constant 0 : i32
    return %c0_i32 : i32
  }
  func.func @transform_6(%arg0: i32, %arg1: i32, %arg2: memref<4xi32, #tpu.memory_space<smem>>, %arg3: memref<4xi32, #tpu.memory_space<smem>>) -> (i32, i32, i32) {
    %0 = arith.index_cast %arg0 : i32 to index
    %1 = memref.load %arg3[%0] : memref<4xi32, #tpu.memory_space<smem>>
    %c0_i32 = arith.constant 0 : i32
    %c0_i32_0 = arith.constant 0 : i32
    return %1, %arg1, %c0_i32 : i32, i32, i32
  }
}

</mosaic_0001>

<bundles_post_ra>
// kernel: custom-call
= control target key start
LH: loop header
LB: loop body
LE: loop exit
PB: predicated region body
PF: predicated region fallthrough
CT: control target
= control target key end

     0   :  { %v45_v1 = vlaneseq  ;;  %v2675_v2 = vmov 2147483648   ;;  %v2676_v3 = vmov 2147483647   ;;  %v2677_v37 = vmov 839939668   ;;  %s2926_s0 = inlined_call_operand.vmem [shape: f32[4,4], index: 0, kind: input, shape index: {}]   ;;  %s2927_s1 = inlined_call_operand.vmem [shape: f32[4,1], index: 1, kind: output, shape index: {0}]   ;;  %s2928_s2 = inlined_call_operand.vmem [shape: s32[4,1], index: 2, kind: output, shape index: {1}]  }
   0x1   :  { %v27_v0 = vld [vmem:[%s2926_s0] sm:$0xf]  ;;  %62 = vst [vmem:[#allocation12] sm:$0xff] %v2675_v2  ;;  %63 = vst [vmem:[#allocation14] sm:$0xff] %v2676_v3  ;;  %v1570_v38 = vunpack.c.l.s4 %v2677_v37  ;;  %v2678_v40 = vmov 1417023538  }
   0x2   :  { %28 = vst [vmem:[#allocation15] sm:$0xf] %v27_v0  ;;  %v2700_v4 = vshrl.u32 %v45_v1, 7  ;;  %v1598_v41 = vunpack.c.l.s4 %v2678_v40  ;;  %v2679_v55 = vmov 1732584193  }
   0x3   :  { %v1571_v39 = vunpack.c.0.s8 %v1570_v38  ;;  %v1626_v56 = vunpack.c.l.s4 %v2679_v55 }
   0x4   :  { %vm53_vm1 = vcmp.lt.s32.totalorder %v2700_v4, 4  ;;  %v75_v7 = vrot.slane %v2700_v4, 1  ;;  %v1591_v45 = vand.u32 4, %v2700_v4  ;;  %v1599_v46 = vunpack.c.0.s8 %v1598_v41 }
   0x5   :  { %v2707_v44 = vsub.s32 %v1571_v39, %v2700_v4  ;;  %v1619_v59 = vand.u32 2, %v2700_v4  ;;  %v1627_v60 = vunpack.c.0.s8 %v1626_v56 }
   0x6   :  { %vm79_vm2 = vcmp.lt.s32.totalorder %v75_v7, %v2700_v4  ;;  %v2719_v58 = vsub.s32 %v1599_v46, %v2700_v4 }
   0x9   :  { %v48_v5 = vld [vmem:[#allocation15] sm:$0xff] }
   0xa   :  { %vm49_vm0 = vcmp.lt.s32.totalorder %v48_v5, 0  ;;  %v50_v6 = vsub.s32 2147483647, %v48_v5 }
   0xc   :  { %v51_v8 = vsel %vm49_vm0, %v50_v6, %v48_v5  ;;  %v2733_v6 = vsub.s32 %v1627_v60, %v2700_v4 }
   0xd   :  { %v54_v9 = vsel %vm53_vm1, %v51_v8, 2147483648 }
   0xe   :  { %55 = vst [vmem:[#allocation15] sm:$0xff] %v54_v9  ;;  %v74_v10 = vrot.slane %v54_v9, 1 }
  0x10   :  { %vm77_vm3 = vcmp.gt.s32.totalorder %v74_v10, %v54_v9  ;;  %vm78_vm4 = vcmp.eq.s32.totalorder %v74_v10, %v54_v9 }
  0x11   :  { %vm80_vm5 = vmand %vm78_vm4, %vm79_vm2 }
  0x12   :  { %vm81_vm6 = vmor %vm77_vm3, %vm80_vm5 }
  0x13   :  { %v82_v11 = vsel %vm81_vm6, %v74_v10, %v54_v9  ;;  %v83_v12 = vsel %vm81_vm6, %v75_v7, %v2700_v4  ;;  %v1647_v10 = vand.u32 1, %v2700_v4 }
  0x14   :  { %v85_v13 = vrot.slane %v82_v11, 1  ;;  %v86_v14 = vrot.slane %v83_v12, 1 }
  0x16   :  { %vm88_vm7 = vcmp.gt.s32.totalorder %v85_v13, %v82_v11  ;;  %vm89_vm8 = vcmp.eq.s32.totalorder %v85_v13, %v82_v11  ;;  %vm90_vm9 = vcmp.lt.s32.totalorder %v86_v14, %v83_v12 }
  0x17   :  { %vm91_vm10 = vmand %vm89_vm8, %vm90_vm9 }
  0x18   :  { %vm92_vm11 = vmor %vm88_vm7, %vm91_vm10 }
  0x19   :  { %v93_v15 = vsel %vm92_vm11, %v85_v13, %v82_v11  ;;  %v94_v16 = vsel %vm92_vm11, %v86_v14, %v83_v12 }
  0x1a   :  { %v96_v17 = vrot.slane %v93_v15, 1  ;;  %v97_v18 = vrot.slane %v94_v16, 1 }
  0x1c   :  { %vm99_vm12 = vcmp.gt.s32.totalorder %v96_v17, %v93_v15  ;;  %vm100_vm13 = vcmp.eq.s32.totalorder %v96_v17, %v93_v15  ;;  %vm101_vm14 = vcmp.lt.s32.totalorder %v97_v18, %v94_v16 }
  0x1d   :  { %vm102_vm15 = vmand %vm100_vm13, %vm101_vm14 }
  0x1e   :  { %vm103_vm0 = vmor %vm99_vm12, %vm102_vm15 }
  0x1f   :  { %v104_v19 = vsel %vm103_vm0, %v96_v17, %v93_v15  ;;  %v105_v20 = vsel %vm103_vm0, %v97_v18, %v94_v16 }
  0x20   :  { %v107_v21 = vrot.slane %v104_v19, 1  ;;  %v108_v22 = vrot.slane %v105_v20, 1 }
  0x22   :  { %vm110_vm1 = vcmp.gt.s32.totalorder %v107_v21, %v104_v19  ;;  %vm111_vm2 = vcmp.eq.s32.totalorder %v107_v21, %v104_v19  ;;  %vm112_vm3 = vcmp.lt.s32.totalorder %v108_v22, %v105_v20 }
  0x23   :  { %vm113_vm4 = vmand %vm111_vm2, %vm112_vm3 }
  0x24   :  { %vm114_vm5 = vmor %vm110_vm1, %vm113_vm4 }
  0x25   :  { %v115_v23 = vsel %vm114_vm5, %v107_v21, %v104_v19  ;;  %v116_v24 = vsel %vm114_vm5, %v108_v22, %v105_v20 }
  0x26   :  { %v118_v25 = vrot.slane %v115_v23, 1  ;;  %v119_v26 = vrot.slane %v116_v24, 1 }
  0x28   :  { %vm121_vm6 = vcmp.gt.s32.totalorder %v118_v25, %v115_v23  ;;  %vm122_vm7 = vcmp.eq.s32.totalorder %v118_v25, %v115_v23  ;;  %vm123_vm8 = vcmp.lt.s32.totalorder %v119_v26, %v116_v24 }
  0x29   :  { %vm124_vm9 = vmand %vm122_vm7, %vm123_vm8 }
  0x2a   :  { %vm125_vm10 = vmor %vm121_vm6, %vm124_vm9 }
  0x2b   :  { %v126_v27 = vsel %vm125_vm10, %v118_v25, %v115_v23  ;;  %v127_v28 = vsel %vm125_vm10, %v119_v26, %v116_v24  ;;  %vm2714_vm10 = vcmp.ne.s32.totalorder %v1591_v45, 0 }
  0x2c   :  { %v129_v29 = vrot.slane %v126_v27, 1  ;;  %v130_v30 = vrot.slane %v127_v28, 1 }
  0x2e   :  { %vm132_vm11 = vcmp.gt.s32.totalorder %v129_v29, %v126_v27  ;;  %vm133_vm12 = vcmp.eq.s32.totalorder %v129_v29, %v126_v27  ;;  %vm134_vm13 = vcmp.lt.s32.totalorder %v130_v30, %v127_v28 }
  0x2f   :  { %vm135_vm14 = vmand %vm133_vm12, %vm134_vm13 }
  0x30   :  { %vm136_vm15 = vmor %vm132_vm11, %vm135_vm14 }
  0x31   :  { %v137_v31 = vsel %vm136_vm15, %v129_v29, %v126_v27  ;;  %v138_v32 = vsel %vm136_vm15, %v130_v30, %v127_v28 }
  0x32   :  { %v140_v33 = vrot.slane %v137_v31, 1  ;;  %v141_v34 = vrot.slane %v138_v32, 1 }
  0x34   :  { %vm143_vm0 = vcmp.gt.s32.totalorder %v140_v33, %v137_v31  ;;  %vm144_vm1 = vcmp.eq.s32.totalorder %v140_v33, %v137_v31  ;;  %vm145_vm2 = vcmp.lt.s32.totalorder %v141_v34, %v138_v32 }
  0x35   :  { %vm146_vm3 = vmand %vm144_vm1, %vm145_vm2 }
  0x36   :  { %vm147_vm4 = vmor %vm143_vm0, %vm146_vm3 }
  0x37   :  { %v149_v35 = vsel %vm147_vm4, %v141_v34, %v138_v32  ;;  %v148_v36 = vsel %vm147_vm4, %v140_v33, %v137_v31 }
  0x38   :  { %156 = vxpose.xlu0.b32.start.end [1/1] (short) %v149_v35, 128  ;;  %152 = vst [vmem:[#allocation12] sm:$0x1] %v148_v36  ;;  %154 = vst [vmem:[#allocation14] sm:$0x1] %v149_v35 }
  0x3f   :  { %v1533_v42 = vld [vmem:[#allocation12 + $0x7] ss:$-1 sm:$0xff]  ;;  %v1539_v43 = vld [vmem:[#allocation14 + $0x7] ss:$-1 sm:$0xff] }
  0x40   :  { %vm2538_vm5 = vcmp.lt.s32.totalorder %v1533_v42, 2147483648  ;;  %vm2539_vm6 = vcmp.eq.s32.totalorder %v1533_v42, 2147483648  ;;  %vm2540_vm7 = vcmp.gt.s32.totalorder %v1539_v43, 2147483647 }
  0x41   :  { %vm1554_vm8 = vmand %vm2539_vm6, %vm2540_vm7  ;;  %vm2726_vm6 = vcmp.ne.s32.totalorder %v1619_v59, 0 }
  0x42   :  { %vm1555_vm9 = vmor %vm2538_vm5, %vm1554_vm8 }
  0x43   :  { %v1556_v47 = vsel %vm1555_vm9, 2147483648, %v1533_v42  ;;  %v1558_v48 = vsel %vm1555_vm9, %v1533_v42, 2147483648  ;;  %v1560_v49 = vsel %vm1555_vm9, 2147483647, %v1539_v43  ;;  %v1562_v50 = vsel %vm1555_vm9, %v1539_v43, 2147483647 }
  0x44   :  { %v1575_v51 = vrot.slane %v1556_v47, %v2707_v44  ;;  %v1582_v52 = vrot.slane %v1560_v49, %v2707_v44  ;;  %v1756_v53 = vrot.slane %v1558_v48, %v2707_v44  ;;  %v1763_v54 = vrot.slane %v1562_v50, %v2707_v44 }
  0x46   :  { %vm1584_vm11 = vcmp.gt.s32.totalorder %v1556_v47, %v1575_v51  ;;  %vm1585_vm12 = vcmp.eq.s32.totalorder %v1556_v47, %v1575_v51  ;;  %vm1586_vm13 = vcmp.lt.s32.totalorder %v1560_v49, %v1582_v52  ;;  %vm1766_vm15 = vcmp.eq.s32.totalorder %v1558_v48, %v1756_v53 }
  0x47   :  { %vm1587_vm14 = vmand %vm1585_vm12, %vm1586_vm13  ;;  %vm1767_vm0 = vcmp.lt.s32.totalorder %v1562_v50, %v1763_v54  ;;  %vm1765_vm2 = vcmp.gt.s32.totalorder %v1558_v48, %v1756_v53 }
  0x48   :  { %vm1588_vm1 = vmor %vm1584_vm11, %vm1587_vm14 }
  0x49   :  { %vm1593_vm3 = vmxor %vm1588_vm1, %vm2714_vm10 }
  0x4a   :  { %v1594_v61 = vsel %vm1593_vm3, %v1556_v47, %v1575_v51  ;;  %v1595_v62 = vsel %vm1593_vm3, %v1560_v49, %v1582_v52  ;;  %vm1768_vm4 = vmand %vm1766_vm15, %vm1767_vm0 }
  0x4b   :  { %v1603_v63 = vrot.slane %v1594_v61, %v2719_v58  ;;  %v1610_v0 = vrot.slane %v1595_v62, %v2719_v58  ;;  %vm1769_vm5 = vmor %vm1765_vm2, %vm1768_vm4  ;;  %vm2742_vm4 = vcmp.ne.s32.totalorder %v1647_v10, 0 }
  0x4c   :  { %vm1774_vm7 = vmxor %vm1769_vm5, %vm2714_vm10 }
  0x4d   :  { %vm1612_vm8 = vcmp.gt.s32.totalorder %v1594_v61, %v1603_v63  ;;  %vm1613_vm9 = vcmp.eq.s32.totalorder %v1594_v61, %v1603_v63  ;;  %vm1614_vm11 = vcmp.lt.s32.totalorder %v1595_v62, %v1610_v0  ;;  %v1775_v5 = vsel %vm1774_vm7, %v1558_v48, %v1756_v53 }
  0x4e   :  { %vm1615_vm12 = vmand %vm1613_vm9, %vm1614_vm11  ;;  %v1776_v7 = vsel %vm1774_vm7, %v1562_v50, %v1763_v54  ;;  %v1784_v8 = vrot.slane %v1775_v5, %v2719_v58 }
  0x4f   :  { %vm1616_vm13 = vmor %vm1612_vm8, %vm1615_vm12  ;;  %v1791_v9 = vrot.slane %v1776_v7, %v2719_v58 }
  0x50   :  { %vm1621_vm14 = vmxor %vm1616_vm13, %vm2726_vm6  ;;  %vm1793_vm15 = vcmp.gt.s32.totalorder %v1775_v5, %v1784_v8  ;;  %vm1794_vm0 = vcmp.eq.s32.totalorder %v1775_v5, %v1784_v8 }
  0x51   :  { %v1622_v11 = vsel %vm1621_vm14, %v1594_v61, %v1603_v63  ;;  %v1623_v12 = vsel %vm1621_vm14, %v1595_v62, %v1610_v0  ;;  %vm1795_vm1 = vcmp.lt.s32.totalorder %v1776_v7, %v1791_v9 }
  0x52   :  { %v1631_v13 = vrot.slane %v1622_v11, %v2733_v6  ;;  %v1638_v14 = vrot.slane %v1623_v12, %v2733_v6  ;;  %vm1796_vm2 = vmand %vm1794_vm0, %vm1795_vm1 }
  0x53   :  { %vm1797_vm3 = vmor %vm1793_vm15, %vm1796_vm2 }
  0x54   :  { %vm1640_vm5 = vcmp.gt.s32.totalorder %v1622_v11, %v1631_v13  ;;  %vm1641_vm7 = vcmp.eq.s32.totalorder %v1622_v11, %v1631_v13  ;;  %vm1642_vm8 = vcmp.lt.s32.totalorder %v1623_v12, %v1638_v14  ;;  %vm1802_vm9 = vmxor %vm1797_vm3, %vm2726_vm6 }
  0x55   :  { %vm1643_vm11 = vmand %vm1641_vm7, %vm1642_vm8  ;;  %v1803_v4 = vsel %vm1802_vm9, %v1775_v5, %v1784_v8  ;;  %v1804_v16 = vsel %vm1802_vm9, %v1776_v7, %v1791_v9 }
  0x56   :  { %vm1644_vm12 = vmor %vm1640_vm5, %vm1643_vm11  ;;  %v1812_v17 = vrot.slane %v1803_v4, %v2733_v6  ;;  %v1819_v18 = vrot.slane %v1804_v16, %v2733_v6 }
  0x57   :  { %vm1649_vm13 = vmxor %vm1644_vm12, %vm2742_vm4 }
  0x58   :  { %v1650_v19 = vsel %vm1649_vm13, %v1622_v11, %v1631_v13  ;;  %v1651_v20 = vsel %vm1649_vm13, %v1623_v12, %v1638_v14  ;;  %vm1821_vm14 = vcmp.gt.s32.totalorder %v1803_v4, %v1812_v17  ;;  %vm1822_vm15 = vcmp.eq.s32.totalorder %v1803_v4, %v1812_v17 }
  0x59   :  { %v1665_v21 = vrot.slane %v1650_v19, %v2707_v44  ;;  %v1672_v22 = vrot.slane %v1651_v20, %v2707_v44  ;;  %vm1823_vm0 = vcmp.lt.s32.totalorder %v1804_v16, %v1819_v18 }
  0x5a   :  { %vm1824_vm1 = vmand %vm1822_vm15, %vm1823_vm0 }
  0x5b   :  { %vm1674_vm2 = vcmp.gt.s32.totalorder %v1650_v19, %v1665_v21  ;;  %vm1675_vm3 = vcmp.eq.s32.totalorder %v1650_v19, %v1665_v21  ;;  %vm1676_vm5 = vcmp.lt.s32.totalorder %v1651_v20, %v1672_v22  ;;  %vm1825_vm7 = vmor %vm1821_vm14, %vm1824_vm1 }
  0x5c   :  { %vm1677_vm8 = vmand %vm1675_vm3, %vm1676_vm5 }
  0x5d   :  { %vm1678_vm9 = vmor %vm1674_vm2, %vm1677_vm8 }
  0x5e   :  { %vm1683_vm11 = vmxor %vm1678_vm9, %vm2714_vm10 }
  0x5f   :  { %v1684_v23 = vsel %vm1683_vm11, %v1650_v19, %v1665_v21  ;;  %v1685_v24 = vsel %vm1683_vm11, %v1651_v20, %v1672_v22  ;;  %vm1830_vm12 = vmxor %vm1825_vm7, %vm2742_vm4 }
  0x60   :  { %v1693_v25 = vrot.slane %v1684_v23, %v2719_v58  ;;  %v1700_v26 = vrot.slane %v1685_v24, %v2719_v58  ;;  %v1831_v27 = vsel %vm1830_vm12, %v1803_v4, %v1812_v17  ;;  %v1832_v28 = vsel %vm1830_vm12, %v1804_v16, %v1819_v18 }
  0x61   :  { %v1846_v29 = vrot.slane %v1831_v27, %v2707_v44  ;;  %v1853_v30 = vrot.slane %v1832_v28, %v2707_v44 }
  0x62   :  { %vm1702_vm13 = vcmp.gt.s32.totalorder %v1684_v23, %v1693_v25  ;;  %vm1703_vm14 = vcmp.eq.s32.totalorder %v1684_v23, %v1693_v25  ;;  %vm1704_vm15 = vcmp.lt.s32.totalorder %v1685_v24, %v1700_v26 }
  0x63   :  { %vm1705_vm0 = vmand %vm1703_vm14, %vm1704_vm15  ;;  %vm1856_vm1 = vcmp.eq.s32.totalorder %v1831_v27, %v1846_v29  ;;  %vm1857_vm2 = vcmp.lt.s32.totalorder %v1832_v28, %v1853_v30  ;;  %vm1855_vm5 = vcmp.gt.s32.totalorder %v1831_v27, %v1846_v29 }
  0x64   :  { %vm1706_vm3 = vmor %vm1702_vm13, %vm1705_vm0 }
  0x65   :  { %vm1711_vm7 = vmxor %vm1706_vm3, %vm2726_vm6 }
  0x66   :  { %v1712_v31 = vsel %vm1711_vm7, %v1684_v23, %v1693_v25  ;;  %v1713_v32 = vsel %vm1711_vm7, %v1685_v24, %v1700_v26  ;;  %vm1858_vm8 = vmand %vm1856_vm1, %vm1857_vm2 }
  0x67   :  { %v1721_v33 = vrot.slane %v1712_v31, %v2733_v6  ;;  %v1728_v34 = vrot.slane %v1713_v32, %v2733_v6  ;;  %vm1859_vm9 = vmor %vm1855_vm5, %vm1858_vm8 }
  0x68   :  { %vm1864_vm11 = vmxor %vm1859_vm9, %vm2714_vm10 }
  0x69   :  { %vm1730_vm12 = vcmp.gt.s32.totalorder %v1712_v31, %v1721_v33  ;;  %vm1731_vm14 = vcmp.eq.s32.totalorder %v1712_v31, %v1721_v33  ;;  %vm1732_vm15 = vcmp.lt.s32.totalorder %v1713_v32, %v1728_v34  ;;  %v1865_v35 = vsel %vm1864_vm11, %v1831_v27, %v1846_v29 }
  0x6a   :  { %vm1733_vm13 = vmand %vm1731_vm14, %vm1732_vm15  ;;  %v1866_v36 = vsel %vm1864_vm11, %v1832_v28, %v1853_v30  ;;  %v1874_v37 = vrot.slane %v1865_v35, %v2719_v58 }
  0x6b   :  { %vm1734_vm0 = vmor %vm1730_vm12, %vm1733_vm13  ;;  %v1881_v38 = vrot.slane %v1866_v36, %v2719_v58 }
  0x6c   :  { %vm1739_vm1 = vmxor %vm1734_vm0, %vm2742_vm4  ;;  %vm1883_vm2 = vcmp.gt.s32.totalorder %v1865_v35, %v1874_v37  ;;  %vm1884_vm3 = vcmp.eq.s32.totalorder %v1865_v35, %v1874_v37 }
  0x6d   :  { %v2772_v39 = vsel %vm1739_vm1, %v1712_v31, %v1721_v33  ;;  %v2774_v40 = vsel %vm1739_vm1, %v1713_v32, %v1728_v34  ;;  %vm1885_vm10 = vcmp.lt.s32.totalorder %v1866_v36, %v1881_v38 }
  0x6e   :  { %vm1886_vm5 = vmand %vm1884_vm3, %vm1885_vm10  ;;  %1935 = vst [vmem:[#allocation9] sm:$0xff] %v2774_v40 }
  0x6f   :  { %vm1887_vm7 = vmor %vm1883_vm2, %vm1886_vm5 }
  0x70   :  { %vm1892_vm8 = vmxor %vm1887_vm7, %vm2726_vm6 }
  0x71   :  { %v1893_v41 = vsel %vm1892_vm8, %v1865_v35, %v1874_v37  ;;  %v1894_v42 = vsel %vm1892_vm8, %v1866_v36, %v1881_v38 }
  0x72   :  { %v1902_v43 = vrot.slane %v1893_v41, %v2733_v6  ;;  %v1909_v44 = vrot.slane %v1894_v42, %v2733_v6 }
  0x74   :  { %vm1911_vm9 = vcmp.gt.s32.totalorder %v1893_v41, %v1902_v43  ;;  %vm1912_vm11 = vcmp.eq.s32.totalorder %v1893_v41, %v1902_v43  ;;  %vm1913_vm12 = vcmp.lt.s32.totalorder %v1894_v42, %v1909_v44 }
  0x75   :  { %vm1914_vm14 = vmand %vm1912_vm11, %vm1913_vm12 }
  0x76   :  { %vm1915_vm15 = vmor %vm1911_vm9, %vm1914_vm14 }
  0x77   :  { %vm1920_vm13 = vmxor %vm1915_vm15, %vm2742_vm4 }
  0x78   :  { %v1921_v45 = vsel %vm1920_vm13, %v1893_v41, %v1902_v43  ;;  %v1922_v46 = vsel %vm1920_vm13, %v1894_v42, %v1909_v44 }
  0x79   :  { %1924 = vst [vmem:[#allocation12] sm:$0xff] %v1921_v45  ;;  %1925 = vst [vmem:[#allocation14] sm:$0xff] %v1922_v46 }
  0xb8   :  { %v172_v47 = vpop.trf.xlu0 }
  0xb9   :  { %2541 = vpush %v172_v47  ;;  %v208_v48 = vrot.slane %v172_v47, 1 }
  0xbb   :  { %2543 = vpush %v208_v48  ;;  %v229_v49 = vrot.slane %v208_v48, 1 }
  0xbc   :  { %v173_v50 = vpop.trf.xlu0 }
  0xbd   :  { %2545 = vpush %v229_v49  ;;  %v250_v51 = vrot.slane %v229_v49, 1  ;;  %v292_v52 = vrot.slane %v173_v50, 1 }
  0xbf   :  { %2547 = vpush %v250_v51  ;;  %v313_v53 = vrot.slane %v292_v52, 1 }
  0xc0   :  { %2549 = vpush %v173_v50  ;;  %v174_v54 = vpop.trf.xlu0 }
  0xc1   :  { %2551 = vpush %v292_v52  ;;  %v334_v55 = vrot.slane %v313_v53, 1  ;;  %v376_v56 = vrot.slane %v174_v54, 1 }
  0xc2   :  { %2553 = vpush %v313_v53 }
  0xc3   :  { %2555 = vpush %v334_v55  ;;  %v397_v57 = vrot.slane %v376_v56, 1 }
  0xc4   :  { %2557 = vpush %v174_v54  ;;  %v175_v58 = vpop.trf.xlu0 }
  0xc5   :  { %2559 = vpush %v376_v56  ;;  %v418_v59 = vrot.slane %v397_v57, 1  ;;  %v460_v60 = vrot.slane %v175_v58, 1 }
  0xc6   :  { %2561 = vpush %v397_v57 }
  0xc7   :  { %2563 = vpush %v418_v59  ;;  %v481_v61 = vrot.slane %v460_v60, 1 }
  0xc8   :  { %2565 = vpush %v175_v58  ;;  %v176_v62 = vpop.trf.xlu0 }
  0xc9   :  { %2567 = vpush %v460_v60  ;;  %v502_v63 = vrot.slane %v481_v61, 1  ;;  %v544_v0 = vrot.slane %v176_v62, 1 }
  0xca   :  { %2569 = vpush %v481_v61 }
  0xcb   :  { %2571 = vpush %v502_v63  ;;  %v565_v3 = vrot.slane %v544_v0, 1 }
  0xcc   :  { %2573 = vpush %v176_v62  ;;  %v177_v5 = vpop.trf.xlu0 }
  0xcd   :  { %2575 = vpush %v544_v0  ;;  %v586_v6 = vrot.slane %v565_v3, 1  ;;  %v628_v7 = vrot.slane %v177_v5, 1 }
  0xce   :  { %2577 = vpush %v565_v3 }
  0xcf   :  { %2579 = vpush %v586_v6  ;;  %v649_v8 = vrot.slane %v628_v7, 1 }
  0xd0   :  { %2581 = vpush %v177_v5  ;;  %v178_v9 = vpop.trf.xlu0 }
  0xd1   :  { %2583 = vpush %v628_v7  ;;  %v670_v10 = vrot.slane %v649_v8, 1  ;;  %v712_v11 = vrot.slane %v178_v9, 1 }
  0xd2   :  { %2585 = vpush %v649_v8 }
  0xd3   :  { %2587 = vpush %v670_v10  ;;  %v733_v12 = vrot.slane %v712_v11, 1 }
  0xd4   :  { %2589 = vpush %v178_v9  ;;  %v179_v13 = vpop.trf.xlu0 }
  0xd5   :  { %2591 = vpush %v712_v11  ;;  %v754_v14 = vrot.slane %v733_v12, 1  ;;  %v796_v15 = vrot.slane %v179_v13, 1 }
  0xd6   :  { %2593 = vpush %v733_v12 }
  0xd7   :  { %2595 = vpush %v754_v14  ;;  %v817_v4 = vrot.slane %v796_v15, 1 }
  0xd8   :  { %2597 = vpush %v179_v13  ;;  %v180_v16 = vpop.trf.xlu0 }
  0xd9   :  { %2599 = vpush %v796_v15  ;;  %v838_v17 = vrot.slane %v817_v4, 1  ;;  %v880_v18 = vrot.slane %v180_v16, 1 }
  0xda   :  { %2601 = vpush %v817_v4 }
  0xdb   :  { %2603 = vpush %v838_v17  ;;  %v901_v19 = vrot.slane %v880_v18, 1 }
  0xdc   :  { %2605 = vpush %v180_v16  ;;  %v181_v20 = vpop.trf.xlu0 }
  0xdd   :  { %2607 = vpush %v880_v18  ;;  %v922_v21 = vrot.slane %v901_v19, 1  ;;  %v964_v22 = vrot.slane %v181_v20, 1 }
  0xde   :  { %2609 = vpush %v901_v19 }
  0xdf   :  { %2611 = vpush %v922_v21  ;;  %v985_v23 = vrot.slane %v964_v22, 1 }
  0xe0   :  { %2613 = vpush %v181_v20  ;;  %v182_v24 = vpop.trf.xlu0 }
  0xe1   :  { %2615 = vpush %v964_v22  ;;  %v1006_v25 = vrot.slane %v985_v23, 1  ;;  %v1048_v26 = vrot.slane %v182_v24, 1 }
  0xe2   :  { %2617 = vpush %v985_v23 }
  0xe3   :  { %2619 = vpush %v1006_v25  ;;  %v1069_v27 = vrot.slane %v1048_v26, 1 }
  0xe4   :  { %2621 = vpush %v182_v24  ;;  %v183_v28 = vpop.trf.xlu0 }
  0xe5   :  { %2623 = vpush %v1048_v26  ;;  %v1090_v29 = vrot.slane %v1069_v27, 1  ;;  %v1132_v30 = vrot.slane %v183_v28, 1 }
  0xe6   :  { %2625 = vpush %v1069_v27 }
  0xe7   :  { %2627 = vpush %v1090_v29  ;;  %v1153_v31 = vrot.slane %v1132_v30, 1 }
  0xe8   :  { %2629 = vpush %v183_v28  ;;  %v184_v32 = vpop.trf.xlu0 }
  0xe9   :  { %2631 = vpush %v1132_v30  ;;  %v1174_v33 = vrot.slane %v1153_v31, 1  ;;  %v1216_v34 = vrot.slane %v184_v32, 1 }
  0xea   :  { %2633 = vpush %v1153_v31  ;;  %s2542_s0 = spop %2541 }
  0xeb   :  { %s189_s11 = sshrl.u32 %s2542_s0, 3  ;;  %2635 = vpush %v1174_v33  ;;  %v1237_v35 = vrot.slane %v1216_v34, 1  ;;  %s191_s12 = ssub.s32 0, %s2542_s0 }
  0xec   :  { %2637 = vpush %v184_v32  ;;  %v185_v36 = vpop.trf.xlu0  ;;  %p190_p0 = scmp.lt.s32.totalorder %s2542_s0, 0  ;;  %s2282_s13 = smin.u32 %s2542_s0, %s191_s12 }
  0xed   :  { %2639 = vpush %v1216_v34  ;;  %v1258_v37 = vrot.slane %v1237_v35, 1  ;;  %v1300_v38 = vrot.slane %v185_v36, 1  ;;  %s193_s14 = sand.u32 7, %s2282_s13   ;;  %s2284_s15 = sshll.u32 %s189_s11, 3 }
  0xee   :  { %2641 = vpush %v1237_v35  ;;  %s194_s16 = ssub.s32 0, %s193_s14  ;;  %s2782_s17 = spop %2543 }
  0xef   :  { %2643 = vpush %v1258_v37  ;;  %v1321_v41 = vrot.slane %v1300_v38, 1  ;;  %s2936_s16 = smov (!%p190_p0, %s194_s16), %s193_s14  ;;  %s210_s18 = sshrl.u32 %s2782_s17, 3 }
  0xf0   :  { %2645 = vpush %v185_v36  ;;  %v186_v42 = vpop.trf.xlu0  ;;  %s2283_s19 = sshll.u32 %s2936_s16, 7  ;;  %s212_s20 = ssub.s32 0, %s2782_s17 }
  0xf1   :  { %2647 = vpush %v1300_v38  ;;  %v1342_v43 = vrot.slane %v1321_v41, 1  ;;  %v1384_v44 = vrot.slane %v186_v42, 1  ;;  %v198_v45 = vstv %s2283_s19  ;;  %s2286_s21 = smin.u32 %s2782_s17, %s212_s20  ;;  %p211_p1 = scmp.lt.s32.totalorder %s2782_s17, 0 }
  0xf2   :  { %2649 = vpush %v1321_v41  ;;  %vm200_vm6 = vcmp.eq.s32.totalorder %v45_v1, %v198_v45  ;;  %s214_s22 = sand.u32 7, %s2286_s21   ;;  %s202_s23 = scalar_lea.vmem [#allocation15], %s2284_s15 }
  0xf3   :  { %2651 = vpush %v1342_v43  ;;  %v1405_v46 = vrot.slane %v1384_v44, 1  ;;  %s215_s24 = ssub.s32 0, %s214_s22  ;;  %s2288_s25 = sshll.u32 %s210_s18, 3 }
  0xf4   :  { %2653 = vpush %v186_v42  ;;  %v187_v47 = vpop.trf.xlu0  ;;  %s2938_s24 = smov (!%p211_p1, %s215_s24), %s214_s22  ;;  %s2546_s26 = spop %2545 }
  0xf5   :  { %203 = vst.msk [vmem:[%s202_s23] sm:$0xff] %vm200_vm6, %v2675_v2  ;;  %v1468_v48 = vrot.slane %v187_v47, 1  ;;  %v1426_v49 = vrot.slane %v1405_v46, 1  ;;  %s2287_s27 = sshll.u32 %s2938_s24, 7  ;;  %s231_s28 = sshrl.u32 %s2546_s26, 3 }
  0xf6   :  { %2655 = vpush %v1384_v44  ;;  %v219_v51 = vstv %s2287_s27  ;;  %s233_s29 = ssub.s32 0, %s2546_s26  ;;  %p232_p2 = scmp.lt.s32.totalorder %s2546_s26, 0 }
  0xf7   :  { %2657 = vpush %v1405_v46  ;;  %v1489_v50 = vrot.slane %v1468_v48, 1  ;;  %v220_v53 = vadd.s32 1, %v219_v51  ;;  %s2290_s30 = smin.u32 %s2546_s26, %s233_s29  ;;  %s2292_s5 = sshll.u32 %s231_s28, 3 }
  0xf8   :  { %2659 = vpush %v1426_v49  ;;  %s235_s3 = sand.u32 7, %s2290_s30   ;;  %s223_s6 = scalar_lea.vmem [#allocation15], %s2288_s25 }
  0xf9   :  { %2661 = vpush %v187_v47  ;;  %v1510_v52 = vrot.slane %v1489_v50, 1  ;;  %vm221_vm4 = vcmp.eq.s32.totalorder %v45_v1, %v220_v53  ;;  %s236_s4 = ssub.s32 0, %s235_s3  ;;  %s2548_s7 = spop %2547 }
  0xfa   :  { %2663 = vpush %v1468_v48  ;;  %s2940_s4 = smov (!%p232_p2, %s236_s4), %s235_s3  ;;  %s252_s9 = sshrl.u32 %s2548_s7, 3 }
  0xfb   :  { %2665 = vpush %v1489_v50  ;;  %s2291_s8 = sshll.u32 %s2940_s4, 7  ;;  %s254_s10 = ssub.s32 0, %s2548_s7 }
  0xfc   :  { %2667 = vpush %v1510_v52  ;;  %v240_v54 = vstv %s2291_s8  ;;  %s2294_s0 = smin.u32 %s2548_s7, %s254_s10  ;;  %p253_p3 = scmp.lt.s32.totalorder %s2548_s7, 0 }
  0xfd   :  { %224 = vst.msk [vmem:[%s223_s6] sm:$0xff] %vm221_vm4, %v2675_v2  ;;  %v241_v55 = vadd.s32 2, %v240_v54  ;;  %s256_s11 = sand.u32 7, %s2294_s0   ;;  %s2296_s13 = sshll.u32 %s252_s9, 3 }
  0xfe   :  { %s257_s12 = ssub.s32 0, %s256_s11  ;;  %s244_s14 = scalar_lea.vmem [#allocation15], %s2292_s5 }
  0xff   :  { %vm242_vm0 = vcmp.eq.s32.totalorder %v45_v1, %v241_v55  ;;  %s2942_s12 = smov (!%p253_p3, %s257_s12), %s256_s11  ;;  %s2550_s15 = spop %2549 }
 0x100   :  { %245 = vst.msk [vmem:[%s244_s14] sm:$0xff] %vm242_vm0, %v2675_v2  ;;  %s2295_s16 = sshll.u32 %s2942_s12, 7  ;;  %s273_s17 = sshrl.u32 %s2550_s15, 3 }
 0x101   :  { %v261_v56 = vstv %s2295_s16  ;;  %s275_s18 = ssub.s32 0, %s2550_s15  ;;  %p274_p4 = scmp.lt.s32.totalorder %s2550_s15, 0 }
 0x102   :  { %v262_v57 = vadd.s32 3, %v261_v56  ;;  %s2298_s19 = smin.u32 %s2550_s15, %s275_s18  ;;  %s2300_s22 = sshll.u32 %s273_s17, 3 }
 0x103   :  { %s277_s20 = sand.u32 7, %s2298_s19   ;;  %s265_s23 = scalar_lea.vmem [#allocation15], %s2296_s13 }
 0x104   :  { %vm263_vm1 = vcmp.eq.s32.totalorder %v45_v1, %v262_v57  ;;  %s278_s21 = ssub.s32 0, %s277_s20  ;;  %s2552_s24 = spop %2551 }
 0x105   :  { %266 = vst.msk [vmem:[%s265_s23] sm:$0xff] %vm263_vm1, %v2675_v2  ;;  %s2944_s21 = smov (!%p274_p4, %s278_s21), %s277_s20  ;;  %s294_s26 = sshrl.u32 %s2552_s24, 3 }
 0x106   :  { %s2299_s25 = sshll.u32 %s2944_s21, 7  ;;  %s296_s27 = ssub.s32 0, %s2552_s24 }
 0x107   :  { %v282_v58 = vstv %s2299_s25  ;;  %s2302_s28 = smin.u32 %s2552_s24, %s296_s27  ;;  %p295_p5 = scmp.lt.s32.totalorder %s2552_s24, 0 }
 0x108   :  { %v283_v59 = vadd.s32 8, %v282_v58  ;;  %s298_s29 = sand.u32 7, %s2302_s28   ;;  %s2304_s3 = sshll.u32 %s294_s26, 3 }
 0x109   :  { %s299_s30 = ssub.s32 0, %s298_s29  ;;  %s286_s4 = scalar_lea.vmem [#allocation15], %s2300_s22 }
 0x10a   :  { %vm284_vm2 = vcmp.eq.s32.totalorder %v45_v1, %v283_v59  ;;  %s2946_s30 = smov (!%p295_p5, %s299_s30), %s298_s29  ;;  %s2554_s5 = spop %2553 }
 0x10b   :  { %287 = vst.msk [vmem:[%s286_s4] sm:$0xff] %vm284_vm2, %v2675_v2  ;;  %s2303_s6 = sshll.u32 %s2946_s30, 7  ;;  %s315_s7 = sshrl.u32 %s2554_s5, 3 }
 0x10c   :  { %v303_v60 = vstv %s2303_s6  ;;  %s317_s8 = ssub.s32 0, %s2554_s5  ;;  %p316_p6 = scmp.lt.s32.totalorder %s2554_s5, 0 }
 0x10d   :  { %v304_v61 = vadd.s32 9, %v303_v60  ;;  %s2306_s9 = smin.u32 %s2554_s5, %s317_s8  ;;  %s2308_s11 = sshll.u32 %s315_s7, 3 }
 0x10e   :  { %s319_s10 = sand.u32 7, %s2306_s9   ;;  %s307_s12 = scalar_lea.vmem [#allocation15], %s2304_s3 }
 0x10f   :  { %vm305_vm3 = vcmp.eq.s32.totalorder %v45_v1, %v304_v61  ;;  %s320_s0 = ssub.s32 0, %s319_s10  ;;  %s2556_s13 = spop %2555 }
 0x110   :  { %308 = vst.msk [vmem:[%s307_s12] sm:$0xff] %vm305_vm3, %v2675_v2  ;;  %s2948_s0 = smov (!%p316_p6, %s320_s0), %s319_s10  ;;  %s336_s15 = sshrl.u32 %s2556_s13, 3 }
 0x111   :  { %s2307_s14 = sshll.u32 %s2948_s0, 7  ;;  %s338_s16 = ssub.s32 0, %s2556_s13 }
 0x112   :  { %v324_v62 = vstv %s2307_s14  ;;  %s2310_s17 = smin.u32 %s2556_s13, %s338_s16  ;;  %p337_p7 = scmp.lt.s32.totalorder %s2556_s13, 0 }
 0x113   :  { %v325_v63 = vadd.s32 10, %v324_v62  ;;  %s340_s18 = sand.u32 7, %s2310_s17   ;;  %s2312_s20 = sshll.u32 %s336_s15, 3 }
 0x114   :  { %s341_s19 = ssub.s32 0, %s340_s18  ;;  %s328_s21 = scalar_lea.vmem [#allocation15], %s2308_s11 }
 0x115   :  { %vm326_vm10 = vcmp.eq.s32.totalorder %v45_v1, %v325_v63  ;;  %s2950_s19 = smov (!%p337_p7, %s341_s19), %s340_s18  ;;  %s2558_s22 = spop %2557 }
 0x116   :  { %329 = vst.msk [vmem:[%s328_s21] sm:$0xff] %vm326_vm10, %v2675_v2  ;;  %s2311_s23 = sshll.u32 %s2950_s19, 7  ;;  %s357_s24 = sshrl.u32 %s2558_s22, 3 }
 0x117   :  { %v345_v0 = vstv %s2311_s23  ;;  %s359_s25 = ssub.s32 0, %s2558_s22  ;;  %p358_p8 = scmp.lt.s32.totalorder %s2558_s22, 0 }
 0x118   :  { %v346_v3 = vadd.s32 11, %v345_v0  ;;  %s2314_s26 = smin.u32 %s2558_s22, %s359_s25  ;;  %s2316_s29 = sshll.u32 %s357_s24, 3 }
 0x119   :  { %s361_s27 = sand.u32 7, %s2314_s26   ;;  %s349_s30 = scalar_lea.vmem [#allocation15], %s2312_s20 }
 0x11a   :  { %vm347_vm5 = vcmp.eq.s32.totalorder %v45_v1, %v346_v3  ;;  %s362_s28 = ssub.s32 0, %s361_s27  ;;  %s2560_s3 = spop %2559 }
 0x11b   :  { %350 = vst.msk [vmem:[%s349_s30] sm:$0xff] %vm347_vm5, %v2675_v2  ;;  %s2952_s28 = smov (!%p358_p8, %s362_s28), %s361_s27  ;;  %s378_s5 = sshrl.u32 %s2560_s3, 3 }
 0x11c   :  { %s2315_s4 = sshll.u32 %s2952_s28, 7  ;;  %s380_s6 = ssub.s32 0, %s2560_s3 }
 0x11d   :  { %v366_v5 = vstv %s2315_s4  ;;  %s2318_s7 = smin.u32 %s2560_s3, %s380_s6  ;;  %p379_p9 = scmp.lt.s32.totalorder %s2560_s3, 0 }
 0x11e   :  { %v367_v6 = vadd.s32 16, %v366_v5  ;;  %s382_s8 = sand.u32 7, %s2318_s7   ;;  %s2320_s10 = sshll.u32 %s378_s5, 3 }
 0x11f   :  { %s383_s9 = ssub.s32 0, %s382_s8  ;;  %s370_s0 = scalar_lea.vmem [#allocation15], %s2316_s29 }
 0x120   :  { %vm368_vm7 = vcmp.eq.s32.totalorder %v45_v1, %v367_v6  ;;  %s2954_s9 = smov (!%p379_p9, %s383_s9), %s382_s8  ;;  %s2562_s11 = spop %2561 }
 0x121   :  { %371 = vst.msk [vmem:[%s370_s0] sm:$0xff] %vm368_vm7, %v2675_v2  ;;  %s2319_s12 = sshll.u32 %s2954_s9, 7  ;;  %s399_s13 = sshrl.u32 %s2562_s11, 3 }
 0x122   :  { %v387_v7 = vstv %s2319_s12  ;;  %s401_s14 = ssub.s32 0, %s2562_s11  ;;  %p400_p10 = scmp.lt.s32.totalorder %s2562_s11, 0 }
 0x123   :  { %v388_v8 = vadd.s32 17, %v387_v7  ;;  %s2322_s15 = smin.u32 %s2562_s11, %s401_s14  ;;  %s2324_s18 = sshll.u32 %s399_s13, 3 }
 0x124   :  { %s403_s16 = sand.u32 7, %s2322_s15   ;;  %s391_s19 = scalar_lea.vmem [#allocation15], %s2320_s10 }
 0x125   :  { %vm389_vm8 = vcmp.eq.s32.totalorder %v45_v1, %v388_v8  ;;  %s404_s17 = ssub.s32 0, %s403_s16  ;;  %s2564_s20 = spop %2563 }
 0x126   :  { %392 = vst.msk [vmem:[%s391_s19] sm:$0xff] %vm389_vm8, %v2675_v2  ;;  %s2956_s17 = smov (!%p400_p10, %s404_s17), %s403_s16  ;;  %s420_s22 = sshrl.u32 %s2564_s20, 3 }
 0x127   :  { %s2323_s21 = sshll.u32 %s2956_s17, 7  ;;  %s422_s23 = ssub.s32 0, %s2564_s20 }
 0x128   :  { %v408_v9 = vstv %s2323_s21  ;;  %s2326_s24 = smin.u32 %s2564_s20, %s422_s23  ;;  %p421_p11 = scmp.lt.s32.totalorder %s2564_s20, 0 }
 0x129   :  { %v409_v10 = vadd.s32 18, %v408_v9  ;;  %s424_s25 = sand.u32 7, %s2326_s24   ;;  %s2328_s27 = sshll.u32 %s420_s22, 3 }
 0x12a   :  { %s425_s26 = ssub.s32 0, %s424_s25  ;;  %s412_s28 = scalar_lea.vmem [#allocation15], %s2324_s18 }
 0x12b   :  { %vm410_vm9 = vcmp.eq.s32.totalorder %v45_v1, %v409_v10  ;;  %s2958_s26 = smov (!%p421_p11, %s425_s26), %s424_s25  ;;  %s2566_s29 = spop %2565 }
 0x12c   :  { %413 = vst.msk [vmem:[%s412_s28] sm:$0xff] %vm410_vm9, %v2675_v2  ;;  %s2327_s30 = sshll.u32 %s2958_s26, 7  ;;  %s441_s3 = sshrl.u32 %s2566_s29, 3 }
 0x12d   :  { %v429_v11 = vstv %s2327_s30  ;;  %s443_s4 = ssub.s32 0, %s2566_s29  ;;  %p442_p12 = scmp.lt.s32.totalorder %s2566_s29, 0 }
 0x12e   :  { %v430_v12 = vadd.s32 19, %v429_v11  ;;  %s2330_s5 = smin.u32 %s2566_s29, %s443_s4  ;;  %s2332_s8 = sshll.u32 %s441_s3, 3 }
 0x12f   :  { %s445_s6 = sand.u32 7, %s2330_s5   ;;  %s433_s9 = scalar_lea.vmem [#allocation15], %s2328_s27 }
 0x130   :  { %vm431_vm11 = vcmp.eq.s32.totalorder %v45_v1, %v430_v12  ;;  %s446_s7 = ssub.s32 0, %s445_s6  ;;  %s2568_s10 = spop %2567 }
 0x131   :  { %434 = vst.msk [vmem:[%s433_s9] sm:$0xff] %vm431_vm11, %v2675_v2  ;;  %s2960_s7 = smov (!%p442_p12, %s446_s7), %s445_s6  ;;  %s462_s11 = sshrl.u32 %s2568_s10, 3 }
 0x132   :  { %s2331_s0 = sshll.u32 %s2960_s7, 7  ;;  %s464_s12 = ssub.s32 0, %s2568_s10 }
 0x133   :  { %v450_v13 = vstv %s2331_s0  ;;  %s2334_s13 = smin.u32 %s2568_s10, %s464_s12  ;;  %p463_p13 = scmp.lt.s32.totalorder %s2568_s10, 0 }
 0x134   :  { %v451_v14 = vadd.s32 24, %v450_v13  ;;  %s466_s14 = sand.u32 7, %s2334_s13   ;;  %s2336_s16 = sshll.u32 %s462_s11, 3 }
 0x135   :  { %s467_s15 = ssub.s32 0, %s466_s14  ;;  %s454_s17 = scalar_lea.vmem [#allocation15], %s2332_s8 }
 0x136   :  { %vm452_vm12 = vcmp.eq.s32.totalorder %v45_v1, %v451_v14  ;;  %s2962_s15 = smov (!%p463_p13, %s467_s15), %s466_s14  ;;  %s2570_s18 = spop %2569 }
 0x137   :  { %455 = vst.msk [vmem:[%s454_s17] sm:$0xff] %vm452_vm12, %v2675_v2  ;;  %s2335_s19 = sshll.u32 %s2962_s15, 7  ;;  %s483_s20 = sshrl.u32 %s2570_s18, 3 }
 0x138   :  { %v471_v15 = vstv %s2335_s19  ;;  %s485_s21 = ssub.s32 0, %s2570_s18  ;;  %p484_p0 = scmp.lt.s32.totalorder %s2570_s18, 0 }
 0x139   :  { %v472_v4 = vadd.s32 25, %v471_v15  ;;  %s2338_s22 = smin.u32 %s2570_s18, %s485_s21  ;;  %s2340_s25 = sshll.u32 %s483_s20, 3 }
 0x13a   :  { %s487_s23 = sand.u32 7, %s2338_s22   ;;  %s475_s26 = scalar_lea.vmem [#allocation15], %s2336_s16 }
 0x13b   :  { %vm473_vm14 = vcmp.eq.s32.totalorder %v45_v1, %v472_v4  ;;  %s488_s24 = ssub.s32 0, %s487_s23  ;;  %s2572_s27 = spop %2571 }
 0x13c   :  { %476 = vst.msk [vmem:[%s475_s26] sm:$0xff] %vm473_vm14, %v2675_v2  ;;  %s2964_s24 = smov (!%p484_p0, %s488_s24), %s487_s23  ;;  %s504_s29 = sshrl.u32 %s2572_s27, 3 }
 0x13d   :  { %s2339_s28 = sshll.u32 %s2964_s24, 7  ;;  %s506_s30 = ssub.s32 0, %s2572_s27 }
 0x13e   :  { %v492_v16 = vstv %s2339_s28  ;;  %s2342_s3 = smin.u32 %s2572_s27, %s506_s30  ;;  %p505_p1 = scmp.lt.s32.totalorder %s2572_s27, 0 }
 0x13f   :  { %v493_v17 = vadd.s32 26, %v492_v16  ;;  %s508_s4 = sand.u32 7, %s2342_s3   ;;  %s2344_s6 = sshll.u32 %s504_s29, 3 }
 0x140   :  { %s509_s5 = ssub.s32 0, %s508_s4  ;;  %s496_s7 = scalar_lea.vmem [#allocation15], %s2340_s25 }
 0x141   :  { %vm494_vm15 = vcmp.eq.s32.totalorder %v45_v1, %v493_v17  ;;  %s2966_s5 = smov (!%p505_p1, %s509_s5), %s508_s4  ;;  %s2574_s8 = spop %2573 }
 0x142   :  { %497 = vst.msk [vmem:[%s496_s7] sm:$0xff] %vm494_vm15, %v2675_v2  ;;  %s2343_s9 = sshll.u32 %s2966_s5, 7  ;;  %s525_s10 = sshrl.u32 %s2574_s8, 3 }
 0x143   :  { %v513_v18 = vstv %s2343_s9  ;;  %s527_s0 = ssub.s32 0, %s2574_s8  ;;  %p526_p2 = scmp.lt.s32.totalorder %s2574_s8, 0 }
 0x144   :  { %v514_v19 = vadd.s32 27, %v513_v18  ;;  %s2346_s11 = smin.u32 %s2574_s8, %s527_s0  ;;  %s2348_s14 = sshll.u32 %s525_s10, 3 }
 0x145   :  { %s529_s12 = sand.u32 7, %s2346_s11   ;;  %s517_s15 = scalar_lea.vmem [#allocation15], %s2344_s6 }
 0x146   :  { %vm515_vm13 = vcmp.eq.s32.totalorder %v45_v1, %v514_v19  ;;  %s530_s13 = ssub.s32 0, %s529_s12  ;;  %s2576_s16 = spop %2575 }
 0x147   :  { %518 = vst.msk [vmem:[%s517_s15] sm:$0xff] %vm515_vm13, %v2675_v2  ;;  %s2968_s13 = smov (!%p526_p2, %s530_s13), %s529_s12  ;;  %s546_s18 = sshrl.u32 %s2576_s16, 3 }
 0x148   :  { %s2347_s17 = sshll.u32 %s2968_s13, 7  ;;  %s548_s19 = ssub.s32 0, %s2576_s16 }
 0x149   :  { %v534_v20 = vstv %s2347_s17  ;;  %s2350_s20 = smin.u32 %s2576_s16, %s548_s19  ;;  %p547_p3 = scmp.lt.s32.totalorder %s2576_s16, 0 }
 0x14a   :  { %v535_v21 = vadd.s32 32, %v534_v20  ;;  %s550_s21 = sand.u32 7, %s2350_s20   ;;  %s2352_s23 = sshll.u32 %s546_s18, 3 }
 0x14b   :  { %s551_s22 = ssub.s32 0, %s550_s21  ;;  %s538_s24 = scalar_lea.vmem [#allocation15], %s2348_s14 }
 0x14c   :  { %vm536_vm6 = vcmp.eq.s32.totalorder %v45_v1, %v535_v21  ;;  %s2970_s22 = smov (!%p547_p3, %s551_s22), %s550_s21  ;;  %s2578_s25 = spop %2577 }
 0x14d   :  { %539 = vst.msk [vmem:[%s538_s24] sm:$0xff] %vm536_vm6, %v2675_v2  ;;  %s2351_s26 = sshll.u32 %s2970_s22, 7  ;;  %s567_s27 = sshrl.u32 %s2578_s25, 3 }
 0x14e   :  { %v555_v22 = vstv %s2351_s26  ;;  %s569_s28 = ssub.s32 0, %s2578_s25  ;;  %p568_p4 = scmp.lt.s32.totalorder %s2578_s25, 0 }
 0x14f   :  { %v556_v23 = vadd.s32 33, %v555_v22  ;;  %s2354_s29 = smin.u32 %s2578_s25, %s569_s28  ;;  %s2356_s4 = sshll.u32 %s567_s27, 3 }
 0x150   :  { %s571_s30 = sand.u32 7, %s2354_s29   ;;  %s559_s5 = scalar_lea.vmem [#allocation15], %s2352_s23 }
 0x151   :  { %vm557_vm4 = vcmp.eq.s32.totalorder %v45_v1, %v556_v23  ;;  %s572_s3 = ssub.s32 0, %s571_s30  ;;  %s2580_s6 = spop %2579 }
 0x152   :  { %560 = vst.msk [vmem:[%s559_s5] sm:$0xff] %vm557_vm4, %v2675_v2  ;;  %s2972_s3 = smov (!%p568_p4, %s572_s3), %s571_s30  ;;  %s588_s8 = sshrl.u32 %s2580_s6, 3 }
 0x153   :  { %s2355_s7 = sshll.u32 %s2972_s3, 7  ;;  %s590_s9 = ssub.s32 0, %s2580_s6 }
 0x154   :  { %v576_v24 = vstv %s2355_s7  ;;  %s2358_s10 = smin.u32 %s2580_s6, %s590_s9  ;;  %p589_p5 = scmp.lt.s32.totalorder %s2580_s6, 0 }
 0x155   :  { %v577_v25 = vadd.s32 34, %v576_v24  ;;  %s592_s0 = sand.u32 7, %s2358_s10   ;;  %s2360_s12 = sshll.u32 %s588_s8, 3 }
 0x156   :  { %s593_s11 = ssub.s32 0, %s592_s0  ;;  %s580_s13 = scalar_lea.vmem [#allocation15], %s2356_s4 }
 0x157   :  { %vm578_vm0 = vcmp.eq.s32.totalorder %v45_v1, %v577_v25  ;;  %s2974_s11 = smov (!%p589_p5, %s593_s11), %s592_s0  ;;  %s2582_s14 = spop %2581 }
 0x158   :  { %581 = vst.msk [vmem:[%s580_s13] sm:$0xff] %vm578_vm0, %v2675_v2  ;;  %s2359_s15 = sshll.u32 %s2974_s11, 7  ;;  %s609_s16 = sshrl.u32 %s2582_s14, 3 }
 0x159   :  { %v597_v26 = vstv %s2359_s15  ;;  %s611_s17 = ssub.s32 0, %s2582_s14  ;;  %p610_p6 = scmp.lt.s32.totalorder %s2582_s14, 0 }
 0x15a   :  { %v598_v27 = vadd.s32 35, %v597_v26  ;;  %s2362_s18 = smin.u32 %s2582_s14, %s611_s17  ;;  %s2364_s21 = sshll.u32 %s609_s16, 3 }
 0x15b   :  { %s613_s19 = sand.u32 7, %s2362_s18   ;;  %s601_s22 = scalar_lea.vmem [#allocation15], %s2360_s12 }
 0x15c   :  { %vm599_vm1 = vcmp.eq.s32.totalorder %v45_v1, %v598_v27  ;;  %s614_s20 = ssub.s32 0, %s613_s19  ;;  %s2584_s23 = spop %2583 }
 0x15d   :  { %602 = vst.msk [vmem:[%s601_s22] sm:$0xff] %vm599_vm1, %v2675_v2  ;;  %s2976_s20 = smov (!%p610_p6, %s614_s20), %s613_s19  ;;  %s630_s25 = sshrl.u32 %s2584_s23, 3 }
 0x15e   :  { %s2363_s24 = sshll.u32 %s2976_s20, 7  ;;  %s632_s26 = ssub.s32 0, %s2584_s23 }
 0x15f   :  { %v618_v28 = vstv %s2363_s24  ;;  %s2366_s27 = smin.u32 %s2584_s23, %s632_s26  ;;  %p631_p7 = scmp.lt.s32.totalorder %s2584_s23, 0 }
 0x160   :  { %v619_v29 = vadd.s32 40, %v618_v28  ;;  %s634_s28 = sand.u32 7, %s2366_s27   ;;  %s2368_s30 = sshll.u32 %s630_s25, 3 }
 0x161   :  { %s635_s29 = ssub.s32 0, %s634_s28  ;;  %s622_s3 = scalar_lea.vmem [#allocation15], %s2364_s21 }
 0x162   :  { %vm620_vm2 = vcmp.eq.s32.totalorder %v45_v1, %v619_v29  ;;  %s2978_s29 = smov (!%p631_p7, %s635_s29), %s634_s28  ;;  %s2586_s4 = spop %2585 }
 0x163   :  { %623 = vst.msk [vmem:[%s622_s3] sm:$0xff] %vm620_vm2, %v2675_v2  ;;  %s2367_s5 = sshll.u32 %s2978_s29, 7  ;;  %s651_s6 = sshrl.u32 %s2586_s4, 3 }
 0x164   :  { %v639_v30 = vstv %s2367_s5  ;;  %s653_s7 = ssub.s32 0, %s2586_s4  ;;  %p652_p8 = scmp.lt.s32.totalorder %s2586_s4, 0 }
 0x165   :  { %v640_v31 = vadd.s32 41, %v639_v30  ;;  %s2370_s8 = smin.u32 %s2586_s4, %s653_s7  ;;  %s2372_s0 = sshll.u32 %s651_s6, 3 }
 0x166   :  { %s655_s9 = sand.u32 7, %s2370_s8   ;;  %s643_s11 = scalar_lea.vmem [#allocation15], %s2368_s30 }
 0x167   :  { %vm641_vm3 = vcmp.eq.s32.totalorder %v45_v1, %v640_v31  ;;  %s656_s10 = ssub.s32 0, %s655_s9  ;;  %s2588_s12 = spop %2587 }
 0x168   :  { %644 = vst.msk [vmem:[%s643_s11] sm:$0xff] %vm641_vm3, %v2675_v2  ;;  %s2980_s10 = smov (!%p652_p8, %s656_s10), %s655_s9  ;;  %s672_s14 = sshrl.u32 %s2588_s12, 3 }
 0x169   :  { %s2371_s13 = sshll.u32 %s2980_s10, 7  ;;  %s674_s15 = ssub.s32 0, %s2588_s12 }
 0x16a   :  { %v660_v32 = vstv %s2371_s13  ;;  %s2374_s16 = smin.u32 %s2588_s12, %s674_s15  ;;  %p673_p9 = scmp.lt.s32.totalorder %s2588_s12, 0 }
 0x16b   :  { %v661_v33 = vadd.s32 42, %v660_v32  ;;  %s676_s17 = sand.u32 7, %s2374_s16   ;;  %s2376_s19 = sshll.u32 %s672_s14, 3 }
 0x16c   :  { %s677_s18 = ssub.s32 0, %s676_s17  ;;  %s664_s20 = scalar_lea.vmem [#allocation15], %s2372_s0 }
 0x16d   :  { %vm662_vm10 = vcmp.eq.s32.totalorder %v45_v1, %v661_v33  ;;  %s2982_s18 = smov (!%p673_p9, %s677_s18), %s676_s17  ;;  %s2590_s21 = spop %2589 }
 0x16e   :  { %665 = vst.msk [vmem:[%s664_s20] sm:$0xff] %vm662_vm10, %v2675_v2  ;;  %s2375_s22 = sshll.u32 %s2982_s18, 7  ;;  %s693_s23 = sshrl.u32 %s2590_s21, 3 }
 0x16f   :  { %v681_v34 = vstv %s2375_s22  ;;  %s695_s24 = ssub.s32 0, %s2590_s21  ;;  %p694_p10 = scmp.lt.s32.totalorder %s2590_s21, 0 }
 0x170   :  { %v682_v35 = vadd.s32 43, %v681_v34  ;;  %s2378_s25 = smin.u32 %s2590_s21, %s695_s24  ;;  %s2380_s28 = sshll.u32 %s693_s23, 3 }
 0x171   :  { %s697_s26 = sand.u32 7, %s2378_s25   ;;  %s685_s29 = scalar_lea.vmem [#allocation15], %s2376_s19 }
 0x172   :  { %vm683_vm5 = vcmp.eq.s32.totalorder %v45_v1, %v682_v35  ;;  %s698_s27 = ssub.s32 0, %s697_s26  ;;  %s2592_s30 = spop %2591 }
 0x173   :  { %686 = vst.msk [vmem:[%s685_s29] sm:$0xff] %vm683_vm5, %v2675_v2  ;;  %s2984_s27 = smov (!%p694_p10, %s698_s27), %s697_s26  ;;  %s714_s4 = sshrl.u32 %s2592_s30, 3 }
 0x174   :  { %s2379_s3 = sshll.u32 %s2984_s27, 7  ;;  %s716_s5 = ssub.s32 0, %s2592_s30 }
 0x175   :  { %v702_v36 = vstv %s2379_s3  ;;  %s2382_s6 = smin.u32 %s2592_s30, %s716_s5  ;;  %p715_p11 = scmp.lt.s32.totalorder %s2592_s30, 0 }
 0x176   :  { %v703_v37 = vadd.s32 48, %v702_v36  ;;  %s718_s7 = sand.u32 7, %s2382_s6   ;;  %s2384_s9 = sshll.u32 %s714_s4, 3 }
 0x177   :  { %s719_s8 = ssub.s32 0, %s718_s7  ;;  %s706_s10 = scalar_lea.vmem [#allocation15], %s2380_s28 }
 0x178   :  { %vm704_vm7 = vcmp.eq.s32.totalorder %v45_v1, %v703_v37  ;;  %s2986_s8 = smov (!%p715_p11, %s719_s8), %s718_s7  ;;  %s2594_s0 = spop %2593 }
 0x179   :  { %707 = vst.msk [vmem:[%s706_s10] sm:$0xff] %vm704_vm7, %v2675_v2  ;;  %s2383_s11 = sshll.u32 %s2986_s8, 7  ;;  %s735_s12 = sshrl.u32 %s2594_s0, 3 }
 0x17a   :  { %v723_v38 = vstv %s2383_s11  ;;  %s737_s13 = ssub.s32 0, %s2594_s0  ;;  %p736_p12 = scmp.lt.s32.totalorder %s2594_s0, 0 }
 0x17b   :  { %v724_v41 = vadd.s32 49, %v723_v38  ;;  %s2386_s14 = smin.u32 %s2594_s0, %s737_s13  ;;  %s2388_s17 = sshll.u32 %s735_s12, 3 }
 0x17c   :  { %s739_s15 = sand.u32 7, %s2386_s14   ;;  %s727_s18 = scalar_lea.vmem [#allocation15], %s2384_s9 }
 0x17d   :  { %vm725_vm8 = vcmp.eq.s32.totalorder %v45_v1, %v724_v41  ;;  %s740_s16 = ssub.s32 0, %s739_s15  ;;  %s2596_s19 = spop %2595 }
 0x17e   :  { %728 = vst.msk [vmem:[%s727_s18] sm:$0xff] %vm725_vm8, %v2675_v2  ;;  %s2988_s16 = smov (!%p736_p12, %s740_s16), %s739_s15  ;;  %s756_s21 = sshrl.u32 %s2596_s19, 3 }
 0x17f   :  { %s2387_s20 = sshll.u32 %s2988_s16, 7  ;;  %s758_s22 = ssub.s32 0, %s2596_s19 }
 0x180   :  { %v744_v42 = vstv %s2387_s20  ;;  %s2390_s23 = smin.u32 %s2596_s19, %s758_s22  ;;  %p757_p13 = scmp.lt.s32.totalorder %s2596_s19, 0 }
 0x181   :  { %v745_v43 = vadd.s32 50, %v744_v42  ;;  %s760_s24 = sand.u32 7, %s2390_s23   ;;  %s2392_s26 = sshll.u32 %s756_s21, 3 }
 0x182   :  { %s761_s25 = ssub.s32 0, %s760_s24  ;;  %s748_s27 = scalar_lea.vmem [#allocation15], %s2388_s17 }
 0x183   :  { %vm746_vm9 = vcmp.eq.s32.totalorder %v45_v1, %v745_v43  ;;  %s2990_s25 = smov (!%p757_p13, %s761_s25), %s760_s24  ;;  %s2598_s28 = spop %2597 }
 0x184   :  { %749 = vst.msk [vmem:[%s748_s27] sm:$0xff] %vm746_vm9, %v2675_v2  ;;  %s2391_s29 = sshll.u32 %s2990_s25, 7  ;;  %s777_s30 = sshrl.u32 %s2598_s28, 3 }
 0x185   :  { %v765_v44 = vstv %s2391_s29  ;;  %s779_s3 = ssub.s32 0, %s2598_s28  ;;  %p778_p0 = scmp.lt.s32.totalorder %s2598_s28, 0 }
 0x186   :  { %v766_v45 = vadd.s32 51, %v765_v44  ;;  %s2394_s4 = smin.u32 %s2598_s28, %s779_s3  ;;  %s2396_s7 = sshll.u32 %s777_s30, 3 }
 0x187   :  { %s781_s5 = sand.u32 7, %s2394_s4   ;;  %s769_s8 = scalar_lea.vmem [#allocation15], %s2392_s26 }
 0x188   :  { %vm767_vm11 = vcmp.eq.s32.totalorder %v45_v1, %v766_v45  ;;  %s782_s6 = ssub.s32 0, %s781_s5  ;;  %s2600_s9 = spop %2599 }
 0x189   :  { %770 = vst.msk [vmem:[%s769_s8] sm:$0xff] %vm767_vm11, %v2675_v2  ;;  %s2992_s6 = smov (!%p778_p0, %s782_s6), %s781_s5  ;;  %s798_s0 = sshrl.u32 %s2600_s9, 3 }
 0x18a   :  { %s2395_s10 = sshll.u32 %s2992_s6, 7  ;;  %s800_s11 = ssub.s32 0, %s2600_s9 }
 0x18b   :  { %v786_v46 = vstv %s2395_s10  ;;  %s2398_s12 = smin.u32 %s2600_s9, %s800_s11  ;;  %p799_p1 = scmp.lt.s32.totalorder %s2600_s9, 0 }
 0x18c   :  { %v787_v47 = vadd.s32 56, %v786_v46  ;;  %s802_s13 = sand.u32 7, %s2398_s12   ;;  %s2400_s15 = sshll.u32 %s798_s0, 3 }
 0x18d   :  { %s803_s14 = ssub.s32 0, %s802_s13  ;;  %s790_s16 = scalar_lea.vmem [#allocation15], %s2396_s7 }
 0x18e   :  { %vm788_vm12 = vcmp.eq.s32.totalorder %v45_v1, %v787_v47  ;;  %s2994_s14 = smov (!%p799_p1, %s803_s14), %s802_s13  ;;  %s2602_s17 = spop %2601 }
 0x18f   :  { %791 = vst.msk [vmem:[%s790_s16] sm:$0xff] %vm788_vm12, %v2675_v2  ;;  %s2399_s18 = sshll.u32 %s2994_s14, 7  ;;  %s819_s19 = sshrl.u32 %s2602_s17, 3 }
 0x190   :  { %v807_v48 = vstv %s2399_s18  ;;  %s821_s20 = ssub.s32 0, %s2602_s17  ;;  %p820_p2 = scmp.lt.s32.totalorder %s2602_s17, 0 }
 0x191   :  { %v808_v49 = vadd.s32 57, %v807_v48  ;;  %s2402_s21 = smin.u32 %s2602_s17, %s821_s20  ;;  %s2404_s24 = sshll.u32 %s819_s19, 3 }
 0x192   :  { %s823_s22 = sand.u32 7, %s2402_s21   ;;  %s811_s25 = scalar_lea.vmem [#allocation15], %s2400_s15 }
 0x193   :  { %vm809_vm14 = vcmp.eq.s32.totalorder %v45_v1, %v808_v49  ;;  %s824_s23 = ssub.s32 0, %s823_s22  ;;  %s2604_s26 = spop %2603 }
 0x194   :  { %812 = vst.msk [vmem:[%s811_s25] sm:$0xff] %vm809_vm14, %v2675_v2  ;;  %s2996_s23 = smov (!%p820_p2, %s824_s23), %s823_s22  ;;  %s840_s28 = sshrl.u32 %s2604_s26, 3 }
 0x195   :  { %s2403_s27 = sshll.u32 %s2996_s23, 7  ;;  %s842_s29 = ssub.s32 0, %s2604_s26 }
 0x196   :  { %v828_v50 = vstv %s2403_s27  ;;  %s2406_s30 = smin.u32 %s2604_s26, %s842_s29  ;;  %p841_p3 = scmp.lt.s32.totalorder %s2604_s26, 0 }
 0x197   :  { %v829_v51 = vadd.s32 58, %v828_v50  ;;  %s844_s3 = sand.u32 7, %s2406_s30   ;;  %s2408_s5 = sshll.u32 %s840_s28, 3 }
 0x198   :  { %s845_s4 = ssub.s32 0, %s844_s3  ;;  %s832_s6 = scalar_lea.vmem [#allocation15], %s2404_s24 }
 0x199   :  { %vm830_vm15 = vcmp.eq.s32.totalorder %v45_v1, %v829_v51  ;;  %s2998_s4 = smov (!%p841_p3, %s845_s4), %s844_s3  ;;  %s2606_s7 = spop %2605 }
 0x19a   :  { %833 = vst.msk [vmem:[%s832_s6] sm:$0xff] %vm830_vm15, %v2675_v2  ;;  %s2407_s8 = sshll.u32 %s2998_s4, 7  ;;  %s861_s9 = sshrl.u32 %s2606_s7, 3 }
 0x19b   :  { %v849_v52 = vstv %s2407_s8  ;;  %s863_s10 = ssub.s32 0, %s2606_s7  ;;  %p862_p4 = scmp.lt.s32.totalorder %s2606_s7, 0 }
 0x19c   :  { %v850_v53 = vadd.s32 59, %v849_v52  ;;  %s2410_s0 = smin.u32 %s2606_s7, %s863_s10  ;;  %s2412_s13 = sshll.u32 %s861_s9, 3 }
 0x19d   :  { %s865_s11 = sand.u32 7, %s2410_s0   ;;  %s853_s14 = scalar_lea.vmem [#allocation15], %s2408_s5 }
 0x19e   :  { %vm851_vm13 = vcmp.eq.s32.totalorder %v45_v1, %v850_v53  ;;  %s866_s12 = ssub.s32 0, %s865_s11  ;;  %s2608_s15 = spop %2607 }
 0x19f   :  { %854 = vst.msk [vmem:[%s853_s14] sm:$0xff] %vm851_vm13, %v2675_v2  ;;  %s3000_s12 = smov (!%p862_p4, %s866_s12), %s865_s11  ;;  %s882_s17 = sshrl.u32 %s2608_s15, 3 }
 0x1a0   :  { %s2411_s16 = sshll.u32 %s3000_s12, 7  ;;  %s884_s18 = ssub.s32 0, %s2608_s15 }
 0x1a1   :  { %v870_v54 = vstv %s2411_s16  ;;  %s2414_s19 = smin.u32 %s2608_s15, %s884_s18  ;;  %p883_p5 = scmp.lt.s32.totalorder %s2608_s15, 0 }
 0x1a2   :  { %v871_v55 = vadd.s32 64, %v870_v54  ;;  %s886_s20 = sand.u32 7, %s2414_s19   ;;  %s2416_s22 = sshll.u32 %s882_s17, 3 }
 0x1a3   :  { %s887_s21 = ssub.s32 0, %s886_s20  ;;  %s874_s23 = scalar_lea.vmem [#allocation15], %s2412_s13 }
 0x1a4   :  { %vm872_vm6 = vcmp.eq.s32.totalorder %v45_v1, %v871_v55  ;;  %s3002_s21 = smov (!%p883_p5, %s887_s21), %s886_s20  ;;  %s2610_s24 = spop %2609 }
 0x1a5   :  { %875 = vst.msk [vmem:[%s874_s23] sm:$0xff] %vm872_vm6, %v2675_v2  ;;  %s2415_s25 = sshll.u32 %s3002_s21, 7  ;;  %s903_s26 = sshrl.u32 %s2610_s24, 3 }
 0x1a6   :  { %v891_v56 = vstv %s2415_s25  ;;  %s905_s27 = ssub.s32 0, %s2610_s24  ;;  %p904_p6 = scmp.lt.s32.totalorder %s2610_s24, 0 }
 0x1a7   :  { %v892_v57 = vadd.s32 65, %v891_v56  ;;  %s2418_s28 = smin.u32 %s2610_s24, %s905_s27  ;;  %s2420_s3 = sshll.u32 %s903_s26, 3 }
 0x1a8   :  { %s907_s29 = sand.u32 7, %s2418_s28   ;;  %s895_s4 = scalar_lea.vmem [#allocation15], %s2416_s22 }
 0x1a9   :  { %vm893_vm4 = vcmp.eq.s32.totalorder %v45_v1, %v892_v57  ;;  %s908_s30 = ssub.s32 0, %s907_s29  ;;  %s2612_s5 = spop %2611 }
 0x1aa   :  { %896 = vst.msk [vmem:[%s895_s4] sm:$0xff] %vm893_vm4, %v2675_v2  ;;  %s3004_s30 = smov (!%p904_p6, %s908_s30), %s907_s29  ;;  %s924_s7 = sshrl.u32 %s2612_s5, 3 }
 0x1ab   :  { %s2419_s6 = sshll.u32 %s3004_s30, 7  ;;  %s926_s8 = ssub.s32 0, %s2612_s5 }
 0x1ac   :  { %v912_v58 = vstv %s2419_s6  ;;  %s2422_s9 = smin.u32 %s2612_s5, %s926_s8  ;;  %p925_p7 = scmp.lt.s32.totalorder %s2612_s5, 0 }
 0x1ad   :  { %v913_v59 = vadd.s32 66, %v912_v58  ;;  %s928_s10 = sand.u32 7, %s2422_s9   ;;  %s2424_s11 = sshll.u32 %s924_s7, 3  ;;  %v1929_v58 = vsub.s32 2147483647, %v2772_v39 }
 0x1ae   :  { %s929_s0 = ssub.s32 0, %s928_s10  ;;  %s916_s12 = scalar_lea.vmem [#allocation15], %s2420_s3 }
 0x1af   :  { %vm914_vm0 = vcmp.eq.s32.totalorder %v45_v1, %v913_v59  ;;  %s3006_s0 = smov (!%p925_p7, %s929_s0), %s928_s10  ;;  %s2614_s13 = spop %2613 }
 0x1b0   :  { %917 = vst.msk [vmem:[%s916_s12] sm:$0xff] %vm914_vm0, %v2675_v2  ;;  %s2423_s14 = sshll.u32 %s3006_s0, 7  ;;  %s945_s15 = sshrl.u32 %s2614_s13, 3 }
 0x1b1   :  { %v933_v60 = vstv %s2423_s14  ;;  %s947_s16 = ssub.s32 0, %s2614_s13  ;;  %p946_p8 = scmp.lt.s32.totalorder %s2614_s13, 0 }
 0x1b2   :  { %v934_v61 = vadd.s32 67, %v933_v60  ;;  %s2426_s17 = smin.u32 %s2614_s13, %s947_s16  ;;  %s2428_s20 = sshll.u32 %s945_s15, 3  ;;  %v1945_v60 = vld [vmem:[#allocation9] sm:$0x1] }
 0x1b3   :  { %s949_s18 = sand.u32 7, %s2426_s17   ;;  %s937_s21 = scalar_lea.vmem [#allocation15], %s2424_s11  ;;  %1947 = vst [vmem:[#allocation10] sm:$0x1] %v1945_v60 }
 0x1b4   :  { %vm935_vm1 = vcmp.eq.s32.totalorder %v45_v1, %v934_v61  ;;  %s950_s19 = ssub.s32 0, %s949_s18  ;;  %s2616_s22 = spop %2615 }
 0x1b5   :  { %938 = vst.msk [vmem:[%s937_s21] sm:$0xff] %vm935_vm1, %v2675_v2  ;;  %s3008_s19 = smov (!%p946_p8, %s950_s19), %s949_s18  ;;  %s966_s24 = sshrl.u32 %s2616_s22, 3 }
 0x1b6   :  { %s2427_s23 = sshll.u32 %s3008_s19, 7  ;;  %s968_s25 = ssub.s32 0, %s2616_s22 }
 0x1b7   :  { %v954_v62 = vstv %s2427_s23  ;;  %s2430_s26 = smin.u32 %s2616_s22, %s968_s25  ;;  %p967_p9 = scmp.lt.s32.totalorder %s2616_s22, 0 }
 0x1b8   :  { %v955_v63 = vadd.s32 72, %v954_v62  ;;  %s970_s27 = sand.u32 7, %s2430_s26   ;;  %s2432_s29 = sshll.u32 %s966_s24, 3 }
 0x1b9   :  { %s971_s28 = ssub.s32 0, %s970_s27  ;;  %s958_s30 = scalar_lea.vmem [#allocation15], %s2428_s20 }
 0x1ba   :  { %vm956_vm2 = vcmp.eq.s32.totalorder %v45_v1, %v955_v63  ;;  %s3010_s28 = smov (!%p967_p9, %s971_s28), %s970_s27  ;;  %s2618_s3 = spop %2617  ;;  %v1994_v62 = vld [vmem:[#allocation10] sm:$0x1] }
 0x1bb   :  { %959 = vst.msk [vmem:[%s958_s30] sm:$0xff] %vm956_vm2, %v2675_v2  ;;  %s2431_s4 = sshll.u32 %s3010_s28, 7  ;;  %s987_s5 = sshrl.u32 %s2618_s3, 3  ;;  %1995 = vst [vmem:[%s2928_s2] sm:$0x1] %v1994_v62 }
 0x1bc   :  { %v975_v0 = vstv %s2431_s4  ;;  %s989_s6 = ssub.s32 0, %s2618_s3  ;;  %p988_p10 = scmp.lt.s32.totalorder %s2618_s3, 0 }
 0x1bd   :  { %v976_v3 = vadd.s32 73, %v975_v0  ;;  %s2434_s7 = smin.u32 %s2618_s3, %s989_s6  ;;  %s2436_s10 = sshll.u32 %s987_s5, 3 }
 0x1be   :  { %s991_s8 = sand.u32 7, %s2434_s7   ;;  %s979_s0 = scalar_lea.vmem [#allocation15], %s2432_s29 }
 0x1bf   :  { %vm977_vm3 = vcmp.eq.s32.totalorder %v45_v1, %v976_v3  ;;  %s992_s9 = ssub.s32 0, %s991_s8  ;;  %s2620_s11 = spop %2619 }
 0x1c0   :  { %980 = vst.msk [vmem:[%s979_s0] sm:$0xff] %vm977_vm3, %v2675_v2  ;;  %s3012_s9 = smov (!%p988_p10, %s992_s9), %s991_s8  ;;  %s1008_s13 = sshrl.u32 %s2620_s11, 3 }
 0x1c1   :  { %s2435_s12 = sshll.u32 %s3012_s9, 7  ;;  %s1010_s14 = ssub.s32 0, %s2620_s11 }
 0x1c2   :  { %v996_v5 = vstv %s2435_s12  ;;  %s2438_s15 = smin.u32 %s2620_s11, %s1010_s14  ;;  %p1009_p11 = scmp.lt.s32.totalorder %s2620_s11, 0 }
 0x1c3   :  { %v997_v6 = vadd.s32 74, %v996_v5  ;;  %s1012_s16 = sand.u32 7, %s2438_s15   ;;  %s2440_s18 = sshll.u32 %s1008_s13, 3 }
 0x1c4   :  { %s1013_s17 = ssub.s32 0, %s1012_s16  ;;  %s1000_s19 = scalar_lea.vmem [#allocation15], %s2436_s10 }
 0x1c5   :  { %vm998_vm10 = vcmp.eq.s32.totalorder %v45_v1, %v997_v6  ;;  %s3014_s17 = smov (!%p1009_p11, %s1013_s17), %s1012_s16  ;;  %s2622_s20 = spop %2621 }
 0x1c6   :  { %1001 = vst.msk [vmem:[%s1000_s19] sm:$0xff] %vm998_vm10, %v2675_v2  ;;  %s2439_s21 = sshll.u32 %s3014_s17, 7  ;;  %s1029_s22 = sshrl.u32 %s2622_s20, 3 }
 0x1c7   :  { %v1017_v7 = vstv %s2439_s21  ;;  %s1031_s23 = ssub.s32 0, %s2622_s20  ;;  %p1030_p12 = scmp.lt.s32.totalorder %s2622_s20, 0 }
 0x1c8   :  { %v1018_v8 = vadd.s32 75, %v1017_v7  ;;  %s2442_s24 = smin.u32 %s2622_s20, %s1031_s23  ;;  %s2444_s27 = sshll.u32 %s1029_s22, 3 }
 0x1c9   :  { %s1033_s25 = sand.u32 7, %s2442_s24   ;;  %s1021_s28 = scalar_lea.vmem [#allocation15], %s2440_s18 }
 0x1ca   :  { %vm1019_vm5 = vcmp.eq.s32.totalorder %v45_v1, %v1018_v8  ;;  %s1034_s26 = ssub.s32 0, %s1033_s25  ;;  %s2624_s29 = spop %2623 }
 0x1cb   :  { %1022 = vst.msk [vmem:[%s1021_s28] sm:$0xff] %vm1019_vm5, %v2675_v2  ;;  %s3016_s26 = smov (!%p1030_p12, %s1034_s26), %s1033_s25  ;;  %s1050_s3 = sshrl.u32 %s2624_s29, 3 }
 0x1cc   :  { %s2443_s30 = sshll.u32 %s3016_s26, 7  ;;  %s1052_s4 = ssub.s32 0, %s2624_s29 }
 0x1cd   :  { %v1038_v9 = vstv %s2443_s30  ;;  %s2446_s5 = smin.u32 %s2624_s29, %s1052_s4  ;;  %p1051_p13 = scmp.lt.s32.totalorder %s2624_s29, 0 }
 0x1ce   :  { %v1039_v10 = vadd.s32 80, %v1038_v9  ;;  %s1054_s6 = sand.u32 7, %s2446_s5   ;;  %s2448_s8 = sshll.u32 %s1050_s3, 3 }
 0x1cf   :  { %s1055_s7 = ssub.s32 0, %s1054_s6  ;;  %s1042_s9 = scalar_lea.vmem [#allocation15], %s2444_s27 }
 0x1d0   :  { %vm1040_vm7 = vcmp.eq.s32.totalorder %v45_v1, %v1039_v10  ;;  %s3018_s7 = smov (!%p1051_p13, %s1055_s7), %s1054_s6  ;;  %s2626_s10 = spop %2625 }
 0x1d1   :  { %1043 = vst.msk [vmem:[%s1042_s9] sm:$0xff] %vm1040_vm7, %v2675_v2  ;;  %s2447_s0 = sshll.u32 %s3018_s7, 7  ;;  %s1071_s11 = sshrl.u32 %s2626_s10, 3 }
 0x1d2   :  { %v1059_v11 = vstv %s2447_s0  ;;  %s1073_s12 = ssub.s32 0, %s2626_s10  ;;  %p1072_p0 = scmp.lt.s32.totalorder %s2626_s10, 0 }
 0x1d3   :  { %v1060_v12 = vadd.s32 81, %v1059_v11  ;;  %s2450_s13 = smin.u32 %s2626_s10, %s1073_s12  ;;  %s2452_s16 = sshll.u32 %s1071_s11, 3 }
 0x1d4   :  { %s1075_s14 = sand.u32 7, %s2450_s13   ;;  %s1063_s17 = scalar_lea.vmem [#allocation15], %s2448_s8 }
 0x1d5   :  { %vm1061_vm8 = vcmp.eq.s32.totalorder %v45_v1, %v1060_v12  ;;  %s1076_s15 = ssub.s32 0, %s1075_s14  ;;  %s2628_s18 = spop %2627 }
 0x1d6   :  { %1064 = vst.msk [vmem:[%s1063_s17] sm:$0xff] %vm1061_vm8, %v2675_v2  ;;  %s3020_s15 = smov (!%p1072_p0, %s1076_s15), %s1075_s14  ;;  %s1092_s20 = sshrl.u32 %s2628_s18, 3 }
 0x1d7   :  { %s2451_s19 = sshll.u32 %s3020_s15, 7  ;;  %s1094_s21 = ssub.s32 0, %s2628_s18 }
 0x1d8   :  { %v1080_v13 = vstv %s2451_s19  ;;  %s2454_s22 = smin.u32 %s2628_s18, %s1094_s21  ;;  %p1093_p1 = scmp.lt.s32.totalorder %s2628_s18, 0 }
 0x1d9   :  { %v1081_v14 = vadd.s32 82, %v1080_v13  ;;  %s1096_s23 = sand.u32 7, %s2454_s22   ;;  %s2456_s25 = sshll.u32 %s1092_s20, 3 }
 0x1da   :  { %s1097_s24 = ssub.s32 0, %s1096_s23  ;;  %s1084_s26 = scalar_lea.vmem [#allocation15], %s2452_s16 }
 0x1db   :  { %vm1082_vm9 = vcmp.eq.s32.totalorder %v45_v1, %v1081_v14  ;;  %s3022_s24 = smov (!%p1093_p1, %s1097_s24), %s1096_s23  ;;  %s2630_s27 = spop %2629 }
 0x1dc   :  { %1085 = vst.msk [vmem:[%s1084_s26] sm:$0xff] %vm1082_vm9, %v2675_v2  ;;  %s2455_s28 = sshll.u32 %s3022_s24, 7  ;;  %s1113_s29 = sshrl.u32 %s2630_s27, 3 }
 0x1dd   :  { %v1101_v15 = vstv %s2455_s28  ;;  %s1115_s30 = ssub.s32 0, %s2630_s27  ;;  %p1114_p2 = scmp.lt.s32.totalorder %s2630_s27, 0 }
 0x1de   :  { %v1102_v4 = vadd.s32 83, %v1101_v15  ;;  %s2458_s3 = smin.u32 %s2630_s27, %s1115_s30  ;;  %s2460_s6 = sshll.u32 %s1113_s29, 3 }
 0x1df   :  { %s1117_s4 = sand.u32 7, %s2458_s3   ;;  %s1105_s7 = scalar_lea.vmem [#allocation15], %s2456_s25 }
 0x1e0   :  { %vm1103_vm11 = vcmp.eq.s32.totalorder %v45_v1, %v1102_v4  ;;  %s1118_s5 = ssub.s32 0, %s1117_s4  ;;  %s2632_s8 = spop %2631 }
 0x1e1   :  { %1106 = vst.msk [vmem:[%s1105_s7] sm:$0xff] %vm1103_vm11, %v2675_v2  ;;  %s3024_s5 = smov (!%p1114_p2, %s1118_s5), %s1117_s4  ;;  %s1134_s10 = sshrl.u32 %s2632_s8, 3 }
 0x1e2   :  { %s2459_s9 = sshll.u32 %s3024_s5, 7  ;;  %s1136_s0 = ssub.s32 0, %s2632_s8 }
 0x1e3   :  { %v1122_v16 = vstv %s2459_s9  ;;  %s2462_s11 = smin.u32 %s2632_s8, %s1136_s0  ;;  %p1135_p3 = scmp.lt.s32.totalorder %s2632_s8, 0 }
 0x1e4   :  { %v1123_v17 = vadd.s32 88, %v1122_v16  ;;  %s1138_s12 = sand.u32 7, %s2462_s11   ;;  %s2464_s14 = sshll.u32 %s1134_s10, 3 }
 0x1e5   :  { %s1139_s13 = ssub.s32 0, %s1138_s12  ;;  %s1126_s15 = scalar_lea.vmem [#allocation15], %s2460_s6 }
 0x1e6   :  { %vm1124_vm12 = vcmp.eq.s32.totalorder %v45_v1, %v1123_v17  ;;  %s3026_s13 = smov (!%p1135_p3, %s1139_s13), %s1138_s12  ;;  %s2634_s16 = spop %2633 }
 0x1e7   :  { %1127 = vst.msk [vmem:[%s1126_s15] sm:$0xff] %vm1124_vm12, %v2675_v2  ;;  %s2463_s17 = sshll.u32 %s3026_s13, 7  ;;  %s1155_s18 = sshrl.u32 %s2634_s16, 3 }
 0x1e8   :  { %v1143_v18 = vstv %s2463_s17  ;;  %s1157_s19 = ssub.s32 0, %s2634_s16  ;;  %p1156_p4 = scmp.lt.s32.totalorder %s2634_s16, 0 }
 0x1e9   :  { %v1144_v19 = vadd.s32 89, %v1143_v18  ;;  %s2466_s20 = smin.u32 %s2634_s16, %s1157_s19  ;;  %s2468_s23 = sshll.u32 %s1155_s18, 3 }
 0x1ea   :  { %s1159_s21 = sand.u32 7, %s2466_s20   ;;  %s1147_s24 = scalar_lea.vmem [#allocation15], %s2464_s14 }
 0x1eb   :  { %vm1145_vm14 = vcmp.eq.s32.totalorder %v45_v1, %v1144_v19  ;;  %s1160_s22 = ssub.s32 0, %s1159_s21  ;;  %s2636_s25 = spop %2635 }
 0x1ec   :  { %1148 = vst.msk [vmem:[%s1147_s24] sm:$0xff] %vm1145_vm14, %v2675_v2  ;;  %s3028_s22 = smov (!%p1156_p4, %s1160_s22), %s1159_s21  ;;  %s1176_s27 = sshrl.u32 %s2636_s25, 3 }
 0x1ed   :  { %s2467_s26 = sshll.u32 %s3028_s22, 7  ;;  %s1178_s28 = ssub.s32 0, %s2636_s25 }
 0x1ee   :  { %v1164_v20 = vstv %s2467_s26  ;;  %s2470_s29 = smin.u32 %s2636_s25, %s1178_s28  ;;  %p1177_p5 = scmp.lt.s32.totalorder %s2636_s25, 0 }
 0x1ef   :  { %v1165_v21 = vadd.s32 90, %v1164_v20  ;;  %s1180_s30 = sand.u32 7, %s2470_s29   ;;  %s2472_s4 = sshll.u32 %s1176_s27, 3 }
 0x1f0   :  { %s1181_s3 = ssub.s32 0, %s1180_s30  ;;  %s1168_s5 = scalar_lea.vmem [#allocation15], %s2468_s23 }
 0x1f1   :  { %vm1166_vm15 = vcmp.eq.s32.totalorder %v45_v1, %v1165_v21  ;;  %s3030_s3 = smov (!%p1177_p5, %s1181_s3), %s1180_s30  ;;  %s2638_s6 = spop %2637 }
 0x1f2   :  { %1169 = vst.msk [vmem:[%s1168_s5] sm:$0xff] %vm1166_vm15, %v2675_v2  ;;  %s2471_s7 = sshll.u32 %s3030_s3, 7  ;;  %s1197_s8 = sshrl.u32 %s2638_s6, 3 }
 0x1f3   :  { %v1185_v22 = vstv %s2471_s7  ;;  %s1199_s9 = ssub.s32 0, %s2638_s6  ;;  %p1198_p6 = scmp.lt.s32.totalorder %s2638_s6, 0 }
 0x1f4   :  { %v1186_v23 = vadd.s32 91, %v1185_v22  ;;  %s2474_s10 = smin.u32 %s2638_s6, %s1199_s9  ;;  %s2476_s12 = sshll.u32 %s1197_s8, 3 }
 0x1f5   :  { %s1201_s0 = sand.u32 7, %s2474_s10   ;;  %s1189_s13 = scalar_lea.vmem [#allocation15], %s2472_s4 }
 0x1f6   :  { %vm1187_vm13 = vcmp.eq.s32.totalorder %v45_v1, %v1186_v23  ;;  %s1202_s11 = ssub.s32 0, %s1201_s0  ;;  %s2640_s14 = spop %2639 }
 0x1f7   :  { %1190 = vst.msk [vmem:[%s1189_s13] sm:$0xff] %vm1187_vm13, %v2675_v2  ;;  %s3032_s11 = smov (!%p1198_p6, %s1202_s11), %s1201_s0  ;;  %s1218_s16 = sshrl.u32 %s2640_s14, 3 }
 0x1f8   :  { %s2475_s15 = sshll.u32 %s3032_s11, 7  ;;  %s1220_s17 = ssub.s32 0, %s2640_s14 }
 0x1f9   :  { %v1206_v24 = vstv %s2475_s15  ;;  %s2478_s18 = smin.u32 %s2640_s14, %s1220_s17  ;;  %p1219_p7 = scmp.lt.s32.totalorder %s2640_s14, 0 }
 0x1fa   :  { %v1207_v25 = vadd.s32 96, %v1206_v24  ;;  %s1222_s19 = sand.u32 7, %s2478_s18   ;;  %s2480_s21 = sshll.u32 %s1218_s16, 3 }
 0x1fb   :  { %s1223_s20 = ssub.s32 0, %s1222_s19  ;;  %s1210_s22 = scalar_lea.vmem [#allocation15], %s2476_s12 }
 0x1fc   :  { %vm1208_vm6 = vcmp.eq.s32.totalorder %v45_v1, %v1207_v25  ;;  %s3034_s20 = smov (!%p1219_p7, %s1223_s20), %s1222_s19  ;;  %s2642_s23 = spop %2641 }
 0x1fd   :  { %1211 = vst.msk [vmem:[%s1210_s22] sm:$0xff] %vm1208_vm6, %v2675_v2  ;;  %s2479_s24 = sshll.u32 %s3034_s20, 7  ;;  %s1239_s25 = sshrl.u32 %s2642_s23, 3  ;;  %vm1928_vm6 = vcmp.lt.s32.totalorder %v2772_v39, 0 }
 0x1fe   :  { %v1227_v26 = vstv %s2479_s24  ;;  %s1241_s26 = ssub.s32 0, %s2642_s23  ;;  %p1240_p8 = scmp.lt.s32.totalorder %s2642_s23, 0  ;;  %v1930_v59 = vsel %vm1928_vm6, %v1929_v58, %v2772_v39 }
 0x1ff   :  { %v1228_v27 = vadd.s32 97, %v1227_v26  ;;  %s2482_s27 = smin.u32 %s2642_s23, %s1241_s26  ;;  %s2484_s30 = sshll.u32 %s1239_s25, 3  ;;  %1933 = vst [vmem:[#allocation7] sm:$0xff] %v1930_v59 }
 0x200   :  { %s1243_s28 = sand.u32 7, %s2482_s27   ;;  %s1231_s3 = scalar_lea.vmem [#allocation15], %s2480_s21 }
 0x201   :  { %vm1229_vm4 = vcmp.eq.s32.totalorder %v45_v1, %v1228_v27  ;;  %s1244_s29 = ssub.s32 0, %s1243_s28  ;;  %s2644_s4 = spop %2643 }
 0x202   :  { %1232 = vst.msk [vmem:[%s1231_s3] sm:$0xff] %vm1229_vm4, %v2675_v2  ;;  %s3036_s29 = smov (!%p1240_p8, %s1244_s29), %s1243_s28  ;;  %s1260_s6 = sshrl.u32 %s2644_s4, 3 }
 0x203   :  { %s2483_s5 = sshll.u32 %s3036_s29, 7  ;;  %s1262_s7 = ssub.s32 0, %s2644_s4 }
 0x204   :  { %v1248_v28 = vstv %s2483_s5  ;;  %s2486_s8 = smin.u32 %s2644_s4, %s1262_s7  ;;  %p1261_p9 = scmp.lt.s32.totalorder %s2644_s4, 0 }
 0x205   :  { %v1249_v29 = vadd.s32 98, %v1248_v28  ;;  %s1264_s9 = sand.u32 7, %s2486_s8   ;;  %s2488_s0 = sshll.u32 %s1260_s6, 3 }
 0x206   :  { %s1265_s10 = ssub.s32 0, %s1264_s9  ;;  %s1252_s11 = scalar_lea.vmem [#allocation15], %s2484_s30  ;;  %v1939_v61 = vld [vmem:[#allocation7] sm:$0x1] }
 0x207   :  { %vm1250_vm0 = vcmp.eq.s32.totalorder %v45_v1, %v1249_v29  ;;  %s3038_s10 = smov (!%p1261_p9, %s1265_s10), %s1264_s9  ;;  %s2646_s12 = spop %2645  ;;  %1941 = vst [vmem:[#allocation8] sm:$0x1] %v1939_v61 }
 0x208   :  { %1253 = vst.msk [vmem:[%s1252_s11] sm:$0xff] %vm1250_vm0, %v2675_v2  ;;  %s2487_s13 = sshll.u32 %s3038_s10, 7  ;;  %s1281_s14 = sshrl.u32 %s2646_s12, 3 }
 0x209   :  { %v1269_v30 = vstv %s2487_s13  ;;  %s1283_s15 = ssub.s32 0, %s2646_s12  ;;  %p1282_p10 = scmp.lt.s32.totalorder %s2646_s12, 0 }
 0x20a   :  { %v1270_v31 = vadd.s32 99, %v1269_v30  ;;  %s2490_s16 = smin.u32 %s2646_s12, %s1283_s15  ;;  %s2492_s19 = sshll.u32 %s1281_s14, 3 }
 0x20b   :  { %s1285_s17 = sand.u32 7, %s2490_s16   ;;  %s1273_s20 = scalar_lea.vmem [#allocation15], %s2488_s0 }
 0x20c   :  { %vm1271_vm1 = vcmp.eq.s32.totalorder %v45_v1, %v1270_v31  ;;  %s1286_s18 = ssub.s32 0, %s1285_s17  ;;  %s2648_s21 = spop %2647 }
 0x20d   :  { %1274 = vst.msk [vmem:[%s1273_s20] sm:$0xff] %vm1271_vm1, %v2675_v2  ;;  %s3040_s18 = smov (!%p1282_p10, %s1286_s18), %s1285_s17  ;;  %s1302_s23 = sshrl.u32 %s2648_s21, 3 }
 0x20e   :  { %s2491_s22 = sshll.u32 %s3040_s18, 7  ;;  %s1304_s24 = ssub.s32 0, %s2648_s21 }
 0x20f   :  { %v1290_v32 = vstv %s2491_s22  ;;  %s2494_s25 = smin.u32 %s2648_s21, %s1304_s24  ;;  %p1303_p11 = scmp.lt.s32.totalorder %s2648_s21, 0 }
 0x210   :  { %v1291_v33 = vadd.s32 104, %v1290_v32  ;;  %s1306_s26 = sand.u32 7, %s2494_s25   ;;  %s2496_s28 = sshll.u32 %s1302_s23, 3 }
 0x211   :  { %s1307_s27 = ssub.s32 0, %s1306_s26  ;;  %s1294_s29 = scalar_lea.vmem [#allocation15], %s2492_s19 }
 0x212   :  { %vm1292_vm2 = vcmp.eq.s32.totalorder %v45_v1, %v1291_v33  ;;  %s3042_s27 = smov (!%p1303_p11, %s1307_s27), %s1306_s26  ;;  %s2650_s30 = spop %2649 }
 0x213   :  { %1295 = vst.msk [vmem:[%s1294_s29] sm:$0xff] %vm1292_vm2, %v2675_v2  ;;  %s2495_s3 = sshll.u32 %s3042_s27, 7  ;;  %s1323_s4 = sshrl.u32 %s2650_s30, 3 }
 0x214   :  { %v1311_v34 = vstv %s2495_s3  ;;  %s1325_s5 = ssub.s32 0, %s2650_s30  ;;  %p1324_p12 = scmp.lt.s32.totalorder %s2650_s30, 0 }
 0x215   :  { %v1312_v35 = vadd.s32 105, %v1311_v34  ;;  %s2498_s6 = smin.u32 %s2650_s30, %s1325_s5  ;;  %s2500_s9 = sshll.u32 %s1323_s4, 3 }
 0x216   :  { %s1327_s7 = sand.u32 7, %s2498_s6   ;;  %s1315_s10 = scalar_lea.vmem [#allocation15], %s2496_s28 }
 0x217   :  { %vm1313_vm3 = vcmp.eq.s32.totalorder %v45_v1, %v1312_v35  ;;  %s1328_s8 = ssub.s32 0, %s1327_s7  ;;  %s2652_s0 = spop %2651 }
 0x218   :  { %1316 = vst.msk [vmem:[%s1315_s10] sm:$0xff] %vm1313_vm3, %v2675_v2  ;;  %s3044_s8 = smov (!%p1324_p12, %s1328_s8), %s1327_s7  ;;  %s1344_s12 = sshrl.u32 %s2652_s0, 3 }
 0x219   :  { %s2499_s11 = sshll.u32 %s3044_s8, 7  ;;  %s1346_s13 = ssub.s32 0, %s2652_s0 }
 0x21a   :  { %v1332_v36 = vstv %s2499_s11  ;;  %s2502_s14 = smin.u32 %s2652_s0, %s1346_s13  ;;  %p1345_p13 = scmp.lt.s32.totalorder %s2652_s0, 0 }
 0x21b   :  { %v1333_v37 = vadd.s32 106, %v1332_v36  ;;  %s1348_s15 = sand.u32 7, %s2502_s14   ;;  %s2504_s17 = sshll.u32 %s1344_s12, 3 }
 0x21c   :  { %s1349_s16 = ssub.s32 0, %s1348_s15  ;;  %s1336_s18 = scalar_lea.vmem [#allocation15], %s2500_s9 }
 0x21d   :  { %vm1334_vm10 = vcmp.eq.s32.totalorder %v45_v1, %v1333_v37  ;;  %s3046_s16 = smov (!%p1345_p13, %s1349_s16), %s1348_s15  ;;  %s2654_s19 = spop %2653 }
 0x21e   :  { %1337 = vst.msk [vmem:[%s1336_s18] sm:$0xff] %vm1334_vm10, %v2675_v2  ;;  %s2503_s20 = sshll.u32 %s3046_s16, 7  ;;  %s1365_s21 = sshrl.u32 %s2654_s19, 3 }
 0x21f   :  { %v1353_v38 = vstv %s2503_s20  ;;  %s1367_s22 = ssub.s32 0, %s2654_s19  ;;  %p1366_p0 = scmp.lt.s32.totalorder %s2654_s19, 0 }
 0x220   :  { %v1354_v41 = vadd.s32 107, %v1353_v38  ;;  %s2506_s23 = smin.u32 %s2654_s19, %s1367_s22  ;;  %s2508_s26 = sshll.u32 %s1365_s21, 3 }
 0x221   :  { %s1369_s24 = sand.u32 7, %s2506_s23   ;;  %s1357_s27 = scalar_lea.vmem [#allocation15], %s2504_s17 }
 0x222   :  { %vm1355_vm5 = vcmp.eq.s32.totalorder %v45_v1, %v1354_v41  ;;  %s1370_s25 = ssub.s32 0, %s1369_s24  ;;  %s2656_s28 = spop %2655 }
 0x223   :  { %1358 = vst.msk [vmem:[%s1357_s27] sm:$0xff] %vm1355_vm5, %v2675_v2  ;;  %s3048_s25 = smov (!%p1366_p0, %s1370_s25), %s1369_s24  ;;  %s1386_s30 = sshrl.u32 %s2656_s28, 3 }
 0x224   :  { %s2507_s29 = sshll.u32 %s3048_s25, 7  ;;  %s1388_s3 = ssub.s32 0, %s2656_s28 }
 0x225   :  { %v1374_v42 = vstv %s2507_s29  ;;  %s2510_s4 = smin.u32 %s2656_s28, %s1388_s3  ;;  %p1387_p1 = scmp.lt.s32.totalorder %s2656_s28, 0 }
 0x226   :  { %v1375_v43 = vadd.s32 112, %v1374_v42  ;;  %s1390_s5 = sand.u32 7, %s2510_s4   ;;  %s2512_s7 = sshll.u32 %s1386_s30, 3 }
 0x227   :  { %s1391_s6 = ssub.s32 0, %s1390_s5  ;;  %s1378_s8 = scalar_lea.vmem [#allocation15], %s2508_s26 }
 0x228   :  { %vm1376_vm7 = vcmp.eq.s32.totalorder %v45_v1, %v1375_v43  ;;  %s3050_s6 = smov (!%p1387_p1, %s1391_s6), %s1390_s5  ;;  %s2658_s9 = spop %2657 }
 0x229   :  { %1379 = vst.msk [vmem:[%s1378_s8] sm:$0xff] %vm1376_vm7, %v2675_v2  ;;  %s2511_s10 = sshll.u32 %s3050_s6, 7  ;;  %s1407_s0 = sshrl.u32 %s2658_s9, 3 }
 0x22a   :  { %v1395_v44 = vstv %s2511_s10  ;;  %s1409_s11 = ssub.s32 0, %s2658_s9  ;;  %p1408_p2 = scmp.lt.s32.totalorder %s2658_s9, 0 }
 0x22b   :  { %v1396_v45 = vadd.s32 113, %v1395_v44  ;;  %s2514_s12 = smin.u32 %s2658_s9, %s1409_s11  ;;  %s2516_s15 = sshll.u32 %s1407_s0, 3 }
 0x22c   :  { %s1411_s13 = sand.u32 7, %s2514_s12   ;;  %s1399_s16 = scalar_lea.vmem [#allocation15], %s2512_s7 }
 0x22d   :  { %vm1397_vm8 = vcmp.eq.s32.totalorder %v45_v1, %v1396_v45  ;;  %s1412_s14 = ssub.s32 0, %s1411_s13  ;;  %s2660_s17 = spop %2659 }
 0x22e   :  { %1400 = vst.msk [vmem:[%s1399_s16] sm:$0xff] %vm1397_vm8, %v2675_v2  ;;  %s3052_s14 = smov (!%p1408_p2, %s1412_s14), %s1411_s13  ;;  %s1428_s19 = sshrl.u32 %s2660_s17, 3 }
 0x22f   :  { %s2515_s18 = sshll.u32 %s3052_s14, 7  ;;  %s1430_s20 = ssub.s32 0, %s2660_s17 }
 0x230   :  { %v1416_v46 = vstv %s2515_s18  ;;  %s2518_s21 = smin.u32 %s2660_s17, %s1430_s20  ;;  %p1429_p3 = scmp.lt.s32.totalorder %s2660_s17, 0 }
 0x231   :  { %v1417_v47 = vadd.s32 114, %v1416_v46  ;;  %s1432_s22 = sand.u32 7, %s2518_s21   ;;  %s2520_s24 = sshll.u32 %s1428_s19, 3 }
 0x232   :  { %s1433_s23 = ssub.s32 0, %s1432_s22  ;;  %s1420_s25 = scalar_lea.vmem [#allocation15], %s2516_s15 }
 0x233   :  { %vm1418_vm9 = vcmp.eq.s32.totalorder %v45_v1, %v1417_v47  ;;  %s3054_s23 = smov (!%p1429_p3, %s1433_s23), %s1432_s22  ;;  %s2662_s26 = spop %2661 }
 0x234   :  { %1421 = vst.msk [vmem:[%s1420_s25] sm:$0xff] %vm1418_vm9, %v2675_v2  ;;  %s2519_s27 = sshll.u32 %s3054_s23, 7  ;;  %s1449_s28 = sshrl.u32 %s2662_s26, 3 }
 0x235   :  { %v1437_v48 = vstv %s2519_s27  ;;  %s1451_s29 = ssub.s32 0, %s2662_s26  ;;  %p1450_p4 = scmp.lt.s32.totalorder %s2662_s26, 0 }
 0x236   :  { %v1438_v49 = vadd.s32 115, %v1437_v48  ;;  %s2522_s30 = smin.u32 %s2662_s26, %s1451_s29  ;;  %s2524_s5 = sshll.u32 %s1449_s28, 3 }
 0x237   :  { %s1453_s3 = sand.u32 7, %s2522_s30   ;;  %s1441_s6 = scalar_lea.vmem [#allocation15], %s2520_s24 }
 0x238   :  { %vm1439_vm11 = vcmp.eq.s32.totalorder %v45_v1, %v1438_v49  ;;  %s1454_s4 = ssub.s32 0, %s1453_s3  ;;  %s2664_s7 = spop %2663 }
 0x239   :  { %1442 = vst.msk [vmem:[%s1441_s6] sm:$0xff] %vm1439_vm11, %v2675_v2  ;;  %s3056_s4 = smov (!%p1450_p4, %s1454_s4), %s1453_s3  ;;  %s1470_s9 = sshrl.u32 %s2664_s7, 3 }
 0x23a   :  { %s2523_s8 = sshll.u32 %s3056_s4, 7  ;;  %s1472_s10 = ssub.s32 0, %s2664_s7 }
 0x23b   :  { %v1458_v50 = vstv %s2523_s8  ;;  %s2526_s0 = smin.u32 %s2664_s7, %s1472_s10  ;;  %p1471_p5 = scmp.lt.s32.totalorder %s2664_s7, 0 }
 0x23c   :  { %v1459_v51 = vadd.s32 120, %v1458_v50  ;;  %s1474_s11 = sand.u32 7, %s2526_s0   ;;  %s2528_s13 = sshll.u32 %s1470_s9, 3 }
 0x23d   :  { %s1475_s12 = ssub.s32 0, %s1474_s11  ;;  %s1462_s14 = scalar_lea.vmem [#allocation15], %s2524_s5 }
 0x23e   :  { %vm1460_vm12 = vcmp.eq.s32.totalorder %v45_v1, %v1459_v51  ;;  %s3058_s12 = smov (!%p1471_p5, %s1475_s12), %s1474_s11  ;;  %s2666_s15 = spop %2665 }
 0x23f   :  { %1463 = vst.msk [vmem:[%s1462_s14] sm:$0xff] %vm1460_vm12, %v2675_v2  ;;  %s2527_s16 = sshll.u32 %s3058_s12, 7  ;;  %s1491_s17 = sshrl.u32 %s2666_s15, 3 }
 0x240   :  { %v1479_v52 = vstv %s2527_s16  ;;  %s1493_s18 = ssub.s32 0, %s2666_s15  ;;  %p1492_p6 = scmp.lt.s32.totalorder %s2666_s15, 0 }
 0x241   :  { %v1480_v53 = vadd.s32 121, %v1479_v52  ;;  %s2530_s19 = smin.u32 %s2666_s15, %s1493_s18  ;;  %s2532_s22 = sshll.u32 %s1491_s17, 3 }
 0x242   :  { %s1495_s20 = sand.u32 7, %s2530_s19   ;;  %s1483_s23 = scalar_lea.vmem [#allocation15], %s2528_s13 }
 0x243   :  { %vm1481_vm14 = vcmp.eq.s32.totalorder %v45_v1, %v1480_v53  ;;  %s1496_s21 = ssub.s32 0, %s1495_s20  ;;  %s2668_s24 = spop %2667 }
 0x244   :  { %1484 = vst.msk [vmem:[%s1483_s23] sm:$0xff] %vm1481_vm14, %v2675_v2  ;;  %s3060_s21 = smov (!%p1492_p6, %s1496_s21), %s1495_s20  ;;  %s1514_s26 = ssub.s32 0, %s2668_s24 }
 0x245   :  { %s2531_s25 = sshll.u32 %s3060_s21, 7  ;;  %s2534_s27 = smin.u32 %s2668_s24, %s1514_s26 }
 0x246   :  { %v1500_v54 = vstv %s2531_s25  ;;  %p1513_p7 = scmp.lt.s32.totalorder %s2668_s24, 0  ;;  %s1516_s28 = sand.u32 7, %s2534_s27  }
 0x247   :  { %v1501_v55 = vadd.s32 122, %v1500_v54  ;;  %s1512_s29 = sshrl.u32 %s2668_s24, 3  ;;  %s1517_s30 = ssub.s32 0, %s1516_s28 }
 0x248   :  { %s1504_s3 = scalar_lea.vmem [#allocation15], %s2532_s22  ;;  %s3062_s30 = smov (!%p1513_p7, %s1517_s30), %s1516_s28 }
 0x249   :  { %vm1502_vm15 = vcmp.eq.s32.totalorder %v45_v1, %v1501_v55  ;;  %s2535_s4 = sshll.u32 %s3062_s30, 7  ;;  %s2536_s5 = sshll.u32 %s1512_s29, 3 }
 0x24a   :  { %1505 = vst.msk [vmem:[%s1504_s3] sm:$0xff] %vm1502_vm15, %v2675_v2  ;;  %v1521_v56 = vstv %s2535_s4  ;;  %s1525_s6 = scalar_lea.vmem [#allocation15], %s2536_s5 }
 0x24b   :  { %v1522_v57 = vadd.s32 123, %v1521_v56 }
 0x24d   :  { %vm1523_vm13 = vcmp.eq.s32.totalorder %v45_v1, %v1522_v57  ;;  %v1963_v1 = vld [vmem:[#allocation8] sm:$0x1] }
 0x24e   :  { %1526 = vst.msk [vmem:[%s1525_s6] sm:$0xff] %vm1523_vm13, %v2675_v2  ;;  %1964 = vst [vmem:[%s2927_s1] sm:$0x1] %v1963_v1 }

// kernel: moe_layer_forward.1
= control target key start
LH: loop header
LB: loop body
LE: loop exit
PB: predicated region body
PF: predicated region fallthrough
CT: control target
= control target key end

     0   :  { %s1934_s0 = inlined_call_operand.vmem [shape: s32[4], index: 0, kind: input, shape index: {}]   ;;  %s1935_s2 = inlined_call_operand.vmem [shape: bf16[4,8,128], index: 2, kind: input, shape index: {}]   ;;  %s1936_s3 = inlined_call_operand.vmem [shape: bf16[4,128,512], index: 3, kind: input, shape index: {}]   ;;  %s1937_s4 = inlined_call_operand.vmem [shape: f32[4,1,512], index: 4, kind: input, shape index: {}]   ;;  %s1938_s5 = inlined_call_operand.vmem [shape: bf16[4,512,128], index: 5, kind: input, shape index: {}]   ;;  %s1939_s6 = inlined_call_operand.vmem [shape: f32[4,1,128], index: 6, kind: input, shape index: {}]   ;;  %s1940_s7 = inlined_call_operand.vmem [shape: f32[4], index: 7, kind: input, shape index: {}]   ;;  %s1941_s8 = inlined_call_operand.hbm [shape: f32[4,8,128], index: 8, kind: output, shape index: {}]   ;;  %s1942_s1 = inlined_call_operand.vmem [shape: s32[4], index: 1, kind: input, shape index: {}]  }
   0x1   :  { %s13_s29 = sshll.u32 %s1934_s0, 4  ;;  %s17_s10 = sshll.u32 %s1942_s1, 4  ;;  %s14_s29 = int_to_ptr.vmem [resolvable:$true] %s13_s29  ;;  %s18_s10 = int_to_ptr.vmem [resolvable:$true] %s17_s10 }
   0x2   :  { %s1524_s11 = scalar_lea.vmem %s14_s29, 16  ;;  %p1529_p1 = scmp.lt.s32.totalorder %s14_s29, %s14_s29 }
   0x3   :  { %p1525_p0 = scmp.ne.s32.totalorder %s14_s29, %s1524_s11  ;;  %p1530_p2 = scmp.lt.s32.totalorder %s1524_s11, %s1524_s11 }
   0x5   :  { %p1531_p3 = por %p1530_p2, %p1529_p1 }
   0x7   :  { %p1532_p4 = pnand %p1531_p3, %p1525_p0 }
   0x9   :  { %1535 = shalt.err (!%p1532_p4)  }
   0xa   :  { %s1649_s12 = smov [#allocation3]   ;;  %s1536_s13 = scalar_lea.vmem %s18_s10, 16 }
   0xb   :  { %16 = dma.vmem_to_smem %s14_s29, 16, %s1649_s12, [#allocation2] }
   0xc   :  { %p1537_p5 = scmp.ne.s32.totalorder %s18_s10, %s1536_s13  ;;  %p1541_p6 = scmp.lt.s32.totalorder %s18_s10, %s18_s10 }
   0xd   :  { %p1542_p7 = scmp.lt.s32.totalorder %s1536_s13, %s1536_s13 }
   0xf   :  { %p1543_p8 = por %p1542_p7, %p1541_p6 }
  0x11   :  { %p1544_p9 = pnand %p1543_p8, %p1537_p5 }
  0x13   :  { %1547 = shalt.err (!%p1544_p9)  }
  0x14   :  { %s1650_s0 = smov [#allocation4]  }
  0x15   :  { %20 = dma.vmem_to_smem %s18_s10, 16, %s1650_s0, [#allocation2] }
  0x16   :  { %1615 = dma.done.wait [#allocation2], 32 }
  0x17   :  { %1616 = vsyncadd [#allocation2], 4294967264 }
  0x18   :  { %22 = sfence }
  0x19   :  { %23 = vsyncpa [#allocation7], 0 }
  0x1a   :  { %24 = vsyncpa [#allocation6], 0 }
  0x1b   :  { %26 = vsyncpa [#allocation6 + $0x1], 0  ;;  %s1705_s1 = smov 0   ;;  %s1707_s14 = smov 0  }
  0x1c   :  { %s1709_s15 = smov 0   ;;  %s1711_s16 = smov 0  }
  0x1d   :  { %s1713_s17 = smov 0   ;;  %s1715_s18 = smov 0  }
  0x1e LB: > { %s1236_s19 = sadd.s32 4294967295, %s1647_s18   ;;  %s1237_s20 = sadd.s32 4294967294, %s1647_s18   ;;  %s1647_s18 = sphi %s1715_s18, %s32_s18   ;;  %s1643_s17 = sphi %s1713_s17, %s1953_s17   ;;  %s1639_s16 = sphi %s1711_s16, %s1952_s16   ;;  %s1635_s15 = sphi %s1709_s15, %s1951_s15   ;;  %s1631_s14 = sphi %s1707_s14, %s1950_s14   ;;  %s1627_s1 = sphi %s1705_s1, %s1949_s1  }
  0x1f   : > { %s44_s21 = sadd.s32 1, %s1643_s17  ;;  %s211_s22 = sld [smem:[#allocation4 + %s1643_s17]] }
  0x20   : > { %p46_p10 = scmp.ge.s32.totalorder %s44_s21, 4  ;;  %p228_p11 = scmp.ne.s32.totalorder %s1635_s15, %s1631_s14 }
  0x21   : > { %p229_p12 = scmp.eq.s32.totalorder %s1236_s19, 3  ;;  %p234_p0 = scmp.ne.s32.totalorder %s1631_s14, %s1627_s1 }
  0x22   : > { %s1955_s21 = smov (%p46_p10, %s44_s21), 0  ;;  %p235_p1 = scmp.eq.s32.totalorder %s1237_s20, 3 }
  0x23   : > { %p1743_p13 = por %p229_p12, %p228_p11  ;;  %s212_s24 = sld [smem:[#allocation4 + %s1955_s21]] }
  0x24   : > { %p1238_p2 = scmp.ge.s32.totalorder %s1647_s18, 1  ;;  %p242_p3 = scmp.lt.s32.totalorder %s1647_s18, 5 }
  0x25   : > { %p1752_p4 = por %p235_p1, %p234_p0  ;;  %p1760_p6 = scmp.eq.s32.totalorder %s1236_s19, 0 }
  0x26   : > { %p1756_p5 = pnand %p1238_p2, %p242_p3  ;;  %s255_s30 = sshll.u32 %s1940_s7, 4  ;;  %s256_s30 = int_to_ptr.vmem [resolvable:$true] %s255_s30 }
  0x27   : > { %s1944_s25 = scalar_select %p1752_p4, 1, 0 }
  0x28   : > { %p1373_p7 = pneg %p1756_p5  ;;  %s218_s10 = sadd.s32 1, %s1635_s15 }
  0x29   : > { %s213_s9 = ssub.s32 %s211_s22, %s212_s24  ;;  %s1548_s13 = scalar_lea.vmem %s256_s30, 16 }
  0x2a   : > { %p216_p8 = scmp.eq.s32.totalorder %s213_s9, 0  ;;  %p1772_p9 = pnand %p1760_p6, %p1373_p7 }
  0x2b   : > { %p1549_p10 = scmp.ne.s32.totalorder %s256_s30, %s1548_s13  ;;  %p1556_p1 = scmp.lt.s32.totalorder %s256_s30, %s256_s30 }
  0x2c   : > { %s1777_s12 = scalar_select %p216_p8, %s1635_s15, %s218_s10  }
  0x2d   : > { %p1550_p11 = pneg %p1772_p9  ;;  %p1557_p2 = scmp.lt.s32.totalorder %s1548_s13, %s1548_s13 }
  0x2f   : > { %p1551_p12 = pnand %p1550_p11, %p1549_p10  ;;  %p1558_p3 = por %p1557_p2, %p1556_p1 }
  0x31   : > { %p1552_p0 = pneg %p1551_p12 }
  0x33   : > { %p1559_p4 = pnand %p1558_p3, %p1552_p0 }
  0x35   : > { %1562 = shalt.err (!%p1559_p4)
}
  0x36   : > { %s1651_s0 = smov [#allocation5]   ;;  %317 = sbr.rel (%p1756_p5) target bundleno = 589 (0x24d), region = 44 }
  0x37   : > { %1376 = dma.vmem_to_smem (!%p1772_p9), %s256_s30, 16, %s1651_s0, [#allocation7]  }
  0x3d   : > { %1618 = dma.done.wait (%p1760_p6), [#allocation7], 16  }
  0x3e   : > { %1620 = vsyncadd (%p1760_p6), [#allocation7], 4294967280 }
  0x3f   : > { %323 = sfence }
  0x40   : > { %s381_s19 = sld [smem:[#allocation3 + %s1639_s16]]  ;;  %v1652_v0 = vmov 0  }
  0x41   : > { %656 = vmatprep.mubr.bf16.mxu0 %v1652_v0  ;;  %697 = vmatprep.mubr.bf16.mxu1 %v1652_v0  ;;  %s372_s27 = sld [smem:[#allocation4 + %s1639_s16]] }
  0x42   : > { %s394_s10 = sld [smem:[#allocation3 + %s1639_s16]] }
  0x43   : > { %s1369_s29 = scalar_select %p1743_p13, [#allocation4], [#allocation9] }
  0x44   : > { %s1370_s30 = scalar_select %p1743_p13, %s1639_s16, 0 }
  0x46   : > { %p382_p4 = scmp.lt.s32.totalorder %s381_s19, 3 }
  0x47   : > { %p373_p5 = scmp.lt.s32.totalorder %s372_s27, 3 }
  0x48   : > { %s1957_s19 = smov (!%p382_p4, %s381_s19), 3  ;;  %p395_p6 = scmp.lt.s32.totalorder %s394_s10, 3 }
  0x49   : > { %s1319_s20 = sshll.u32 %s1957_s19, 8  ;;  %s1959_s27 = smov (!%p373_p5, %s372_s27), 3 }
  0x4a   : > { %s1793_s26 = scalar_lea.vmem %s1936_s3, %s1319_s20  ;;  %s1244_s28 = sshll.u32 %s1959_s27, 2 }
  0x4b   : > { %v1436_v1 = vld [vmem:[%s1793_s26 + $0x4] ss:$16 sps:$4 sm:$0xff]   ;;  %v1438_v2 = vld [vmem:[%s1793_s26 + $0xc] ss:$16 sps:$4 sm:$0xff]   ;;  %v1440_v3 = vld [vmem:[%s1793_s26] ss:$16 sps:$4 sm:$0xff]   ;;  %s379_s9 = scalar_lea.vmem %s1935_s2, %s1244_s28 }
  0x4c   : > { %624 = vmatprep.subr.bf16.mxu0 %v1436_v1  ;;  %v1441_v4 = vld [vmem:[%s1793_s26 + $0x8] ss:$16 sps:$4 sm:$0xff]   ;;  %665 = vmatprep.subr.bf16.mxu1 %v1438_v2  ;;  %v1442_v5 = vld [vmem:[%s1793_s26 + $0x24] ss:$16 sps:$4 sm:$0xff]   ;;  %v1444_v6 = vld [vmem:[%s1793_s26 + $0x2c] ss:$16 sps:$4 sm:$0xff]   ;;  %v444_v2 = vlaneseq }
  0x4d   : > { %625 = vmatpush1.bf16.msra.mxu0 %v1440_v3  ;;  %666 = vmatpush1.bf16.msra.mxu1 %v1441_v4  ;;  %v1446_v7 = vld [vmem:[%s1793_s26 + $0x20] ss:$16 sps:$4 sm:$0xff]   ;;  %v1447_v8 = vld [vmem:[%s1793_s26 + $0x28] ss:$16 sps:$4 sm:$0xff]   ;;  %v1448_v9 = vld [vmem:[%s1793_s26 + $0x44] ss:$16 sps:$4 sm:$0xff]  }
  0x4e   : > { %626 = vmatprep.subr.bf16.mxu0 %v1442_v5  ;;  %667 = vmatprep.subr.bf16.mxu1 %v1444_v6  ;;  %v1450_v10 = vld [vmem:[%s1793_s26 + $0x4c] ss:$16 sps:$4 sm:$0xff]   ;;  %v1452_v11 = vld [vmem:[%s1793_s26 + $0x40] ss:$16 sps:$4 sm:$0xff]   ;;  %v1453_v12 = vld [vmem:[%s1793_s26 + $0x48] ss:$16 sps:$4 sm:$0xff]  }
  0x4f   : > { %v1454_v13 = vld [vmem:[%s1793_s26 + $0x64] ss:$16 sps:$4 sm:$0xff]   ;;  %v1456_v14 = vld [vmem:[%s1793_s26 + $0x6c] ss:$16 sps:$4 sm:$0xff]   ;;  %v1458_v15 = vld [vmem:[%s1793_s26 + $0x60] ss:$16 sps:$4 sm:$0xff]  }
  0x50   : > { %v1459_v16 = vld [vmem:[%s1793_s26 + $0x68] ss:$16 sps:$4 sm:$0xff]   ;;  %v1460_v17 = vld [vmem:[%s1793_s26 + $0x84] ss:$16 sps:$4 sm:$0xff]   ;;  %v1462_v18 = vld [vmem:[%s1793_s26 + $0x8c] ss:$16 sps:$4 sm:$0xff]  }
  0x51   : > { %627 = vmatpush1.bf16.msra.mxu0 %v1446_v7  ;;  %668 = vmatpush1.bf16.msra.mxu1 %v1447_v8  ;;  %v1464_v19 = vld [vmem:[%s1793_s26 + $0x80] ss:$16 sps:$4 sm:$0xff]   ;;  %v1465_v20 = vld [vmem:[%s1793_s26 + $0x88] ss:$16 sps:$4 sm:$0xff]   ;;  %v1466_v21 = vld [vmem:[%s1793_s26 + $0xa4] ss:$16 sps:$4 sm:$0xff]  }
  0x52   : > { %628 = vmatprep.subr.bf16.mxu0 %v1448_v9  ;;  %669 = vmatprep.subr.bf16.mxu1 %v1450_v10  ;;  %v1468_v22 = vld [vmem:[%s1793_s26 + $0xac] ss:$16 sps:$4 sm:$0xff]   ;;  %v1470_v23 = vld [vmem:[%s1793_s26 + $0xa0] ss:$16 sps:$4 sm:$0xff]   ;;  %v1471_v24 = vld [vmem:[%s1793_s26 + $0xa8] ss:$16 sps:$4 sm:$0xff]  }
  0x53   : > { %v1472_v25 = vld [vmem:[%s1793_s26 + $0xc4] ss:$16 sps:$4 sm:$0xff]   ;;  %v1474_v26 = vld [vmem:[%s1793_s26 + $0xcc] ss:$16 sps:$4 sm:$0xff]   ;;  %v1476_v27 = vld [vmem:[%s1793_s26 + $0xc0] ss:$16 sps:$4 sm:$0xff]  }
  0x54   : > { %v1477_v28 = vld [vmem:[%s1793_s26 + $0xc8] ss:$16 sps:$4 sm:$0xff]   ;;  %v1478_v29 = vld [vmem:[%s1793_s26 + $0xe4] ss:$16 sps:$4 sm:$0xff]   ;;  %v1480_v30 = vld [vmem:[%s1793_s26 + $0xec] ss:$16 sps:$4 sm:$0xff]  }
  0x55   : > { %629 = vmatpush1.bf16.msra.mxu0 %v1452_v11  ;;  %670 = vmatpush1.bf16.msra.mxu1 %v1453_v12  ;;  %v1482_v31 = vld [vmem:[%s1793_s26 + $0xe0] ss:$16 sps:$4 sm:$0xff]   ;;  %v1483_v32 = vld [vmem:[%s1793_s26 + $0xe8] ss:$16 sps:$4 sm:$0xff]   ;;  %s1961_s10 = smov (!%p395_p6, %s394_s10), 3  ;;  %s388_s20 = sld [smem:[#allocation3 + %s1639_s16]] }
  0x56   : > { %630 = vmatprep.subr.bf16.mxu0 %v1454_v13  ;;  %671 = vmatprep.subr.bf16.mxu1 %v1456_v14  ;;  %v409_v33 = vld [vmem:[%s379_s9] sm:$0xf]  ;;  %s1320_s11 = sshll.u32 %s1961_s10, 8  ;;  %v445_v3 = vshrl.u32 %v444_v2, 7  ;;  %s401_s28 = sld [smem:[#allocation3 + %s1639_s16]] }
  0x57   : > { %s1835_s19 = scalar_lea.vmem %s1938_s5, %s1320_s11  ;;  %s369_s9 = sand.u32 1, %s1631_s14  }
  0x58   : > { %v1484_v34 = vld [vmem:[%s1835_s19 + $0x40] sm:$0xff]   ;;  %v1488_v38 = vld [vmem:[%s1835_s19 + $0x48] sm:$0xff]   ;;  %v1492_v42 = vld [vmem:[%s1835_s19 + $0x50] sm:$0xff]   ;;  %v446_v4 = vsub.s32 0, %v445_v3  ;;  %v454_v5 = vsub.s32 2, %v445_v3  ;;  %v450_v7 = vsub.s32 1, %v445_v3  ;;  %s1100_s11 = sld [smem:[%s1369_s29 + %s1370_s30]] }
  0x59   : > { %631 = vmatpush1.bf16.msra.mxu0 %v1458_v15  ;;  %672 = vmatpush1.bf16.msra.mxu1 %v1459_v16  ;;  %v1485_v35 = vld [vmem:[%s1835_s19 + $0xc0] sm:$0xff]   ;;  %v1489_v39 = vld [vmem:[%s1835_s19 + $0xc8] sm:$0xff]   ;;  %v1493_v43 = vld [vmem:[%s1835_s19 + $0xd0] sm:$0xff]   ;;  %v458_v8 = vsub.s32 3, %v445_v3  ;;  %s408_s10 = sld [smem:[#allocation5 + %s1639_s16]]  ;;  %s1093_s29 = scalar_lea.sflag [#allocation6], %s369_s9 }
  0x5a   : > { %632 = vmatprep.subr.bf16.mxu0 %v1460_v17  ;;  %673 = vmatprep.subr.bf16.mxu1 %v1462_v18  ;;  %v1486_v36 = vld [vmem:[%s1835_s19] sm:$0xff]   ;;  %v1490_v40 = vld [vmem:[%s1835_s19 + $0x8] sm:$0xff]   ;;  %v1494_v44 = vld [vmem:[%s1835_s19 + $0x10] sm:$0xff]  }
  0x5b   : > { %v1487_v37 = vld [vmem:[%s1835_s19 + $0x80] sm:$0xff]   ;;  %v1491_v41 = vld [vmem:[%s1835_s19 + $0x88] sm:$0xff]   ;;  %v1495_v45 = vld [vmem:[%s1835_s19 + $0x90] sm:$0xff]   ;;  %p389_p7 = scmp.lt.s32.totalorder %s388_s20, 3 }
  0x5c   : > { %v1496_v46 = vld [vmem:[%s1835_s19 + $0x58] sm:$0xff]   ;;  %v1500_v50 = vld [vmem:[%s1835_s19 + $0x60] sm:$0xff]   ;;  %v1504_v54 = vld [vmem:[%s1835_s19 + $0x68] sm:$0xff]   ;;  %p402_p8 = scmp.lt.s32.totalorder %s401_s28, 3 }
  0x5d   : > { %633 = vmatpush1.bf16.msra.mxu0 %v1464_v19  ;;  %674 = vmatpush1.bf16.msra.mxu1 %v1465_v20  ;;  %v1497_v47 = vld [vmem:[%s1835_s19 + $0xd8] sm:$0xff]   ;;  %v1501_v51 = vld [vmem:[%s1835_s19 + $0xe0] sm:$0xff]   ;;  %v1505_v55 = vld [vmem:[%s1835_s19 + $0xe8] sm:$0xff]   ;;  %s1963_s20 = smov (!%p389_p7, %s388_s20), 3 }
  0x5e   : > { %634 = vmatprep.subr.bf16.mxu0 %v1466_v21  ;;  %675 = vmatprep.subr.bf16.mxu1 %v1468_v22  ;;  %v1498_v48 = vld [vmem:[%s1835_s19 + $0x18] sm:$0xff]   ;;  %v1502_v52 = vld [vmem:[%s1835_s19 + $0x20] sm:$0xff]   ;;  %v1506_v56 = vld [vmem:[%s1835_s19 + $0x28] sm:$0xff]   ;;  %s1247_s22 = sshll.u32 %s1963_s20, 2  ;;  %s1965_s28 = smov (!%p402_p8, %s401_s28), 3 }
  0x5f   : > { %v1499_v49 = vld [vmem:[%s1835_s19 + $0x98] sm:$0xff]   ;;  %v1503_v53 = vld [vmem:[%s1835_s19 + $0xa0] sm:$0xff]   ;;  %v1507_v57 = vld [vmem:[%s1835_s19 + $0xa8] sm:$0xff]   ;;  %s392_s27 = scalar_lea.vmem %s1937_s4, %s1247_s22  ;;  %s1243_s20 = sshll.u32 %s369_s9, 3 }
  0x60   : > { %v1508_v58 = vld [vmem:[%s1835_s19 + $0x70] sm:$0xff]   ;;  %v1512_v62 = vld [vmem:[%s1835_s19 + $0x78] sm:$0xff]   ;;  %v442_v6 = vld [vmem:[%s392_s27] sm:$0xf]  ;;  %s1316_s16 = sshll.u32 %s1100_s11, 7  ;;  %s371_s22 = scalar_lea.vmem [#allocation8], %s1243_s20 }
  0x61   : > { %635 = vmatpush1.bf16.msra.mxu0 %v1470_v23  ;;  %676 = vmatpush1.bf16.msra.mxu1 %v1471_v24  ;;  %v1509_v59 = vld [vmem:[%s1835_s19 + $0xf0] sm:$0xff]   ;;  %v1513_v63 = vld [vmem:[%s1835_s19 + $0xf8] sm:$0xff]   ;;  %v447_v9 = vrot.slane %v442_v6, %v446_v4  ;;  %v455_v10 = vrot.slane %v442_v6, %v454_v5  ;;  %v451_v11 = vrot.slane %v442_v6, %v450_v7  ;;  %s1108_s24 = sshll.u32 %s371_s22, 4  ;;  %s1889_s24 = int_to_ptr.vmem [resolvable:$true] %s1108_s24 }
  0x62   : > { %636 = vmatprep.subr.bf16.mxu0 %v1472_v25  ;;  %677 = vmatprep.subr.bf16.mxu1 %v1474_v26  ;;  %v1510_v60 = vld [vmem:[%s1835_s19 + $0x30] sm:$0xff]   ;;  %v1514_v0 = vld [vmem:[%s1835_s19 + $0x38] sm:$0xff]   ;;  %v459_v12 = vrot.slane %v442_v6, %v458_v8  ;;  %s1563_s30 = scalar_lea.vmem %s1889_s24, 128 }
  0x63   : > { %v1511_v61 = vld [vmem:[%s1835_s19 + $0xb0] sm:$0xff]   ;;  %v1515_v1 = vld [vmem:[%s1835_s19 + $0xb8] sm:$0xff]   ;;  %s404_s19 = scalar_lea.vmem %s1939_s6, %s1965_s28  ;;  %s1887_s28 = scalar_lea.hbm %s1941_s8, %s1316_s16 }
  0x64   : > { %v1282_v3 = vld [vmem:[%s404_s19] ss:$0 sm:$0xff]  ;;  %p1564_p9 = scmp.ne.s32.totalorder %s1889_s24, %s1563_s30 }
  0x65   : > { %637 = vmatpush1.bf16.msra.mxu0 %v1476_v27  ;;  %678 = vmatpush1.bf16.msra.mxu1 %v1477_v28 }
  0x66   : > { %638 = vmatprep.subr.bf16.mxu0 %v1478_v29  ;;  %679 = vmatprep.subr.bf16.mxu1 %v1480_v30  ;;  %p1565_p10 = pnand %p1564_p9, %p1743_p13 }
  0x68   : > { %p1566_p11 = pneg %p1565_p10 }
  0x69   : > { %639 = vmatpush1.bf16.msra.mxu0 %v1482_v31  ;;  %680 = vmatpush1.bf16.msra.mxu1 %v1483_v32 }
  0x6a   : > { %1321 = vmatprep.subr.bf16.mxu0 %v1484_v34  ;;  %1343 = vmatprep.subr.bf16.mxu1 %v1485_v35 }
  0x6c   : > { %657 = vmatmul.mubr.bf16.vlgmr.msra.gmra.mrb[0].mxu0 %v409_v33  ;;  %698 = vmatmul.mubr.bf16.vlgmr.msra.gmra.mrb[0].mxu1 %v409_v33 }
  0x6d   : > { %1322 = vmatpush3.bf16.msra.mxu0 %v1486_v36  ;;  %1344 = vmatpush3.bf16.msra.mxu1 %v1487_v37 }
  0x6e   : > { %1323 = vmatprep.subr.bf16.mxu0 %v1488_v38  ;;  %1345 = vmatprep.subr.bf16.mxu1 %v1489_v39 }
  0x71   : > { %1324 = vmatpush3.bf16.msra.mxu0 %v1490_v40  ;;  %1346 = vmatpush3.bf16.msra.mxu1 %v1491_v41 }
  0x72   : > { %1325 = vmatprep.subr.bf16.mxu0 %v1492_v42  ;;  %1347 = vmatprep.subr.bf16.mxu1 %v1493_v43 }
  0x75   : > { %1326 = vmatpush3.bf16.msra.mxu0 %v1494_v44  ;;  %1348 = vmatpush3.bf16.msra.mxu1 %v1495_v45 }
  0x76   : > { %1327 = vmatprep.subr.bf16.mxu0 %v1496_v46  ;;  %1349 = vmatprep.subr.bf16.mxu1 %v1497_v47 }
  0x79   : > { %1328 = vmatpush3.bf16.msra.mxu0 %v1498_v48  ;;  %1350 = vmatpush3.bf16.msra.mxu1 %v1499_v49 }
  0x7a   : > { %1329 = vmatprep.subr.bf16.mxu0 %v1500_v50  ;;  %1351 = vmatprep.subr.bf16.mxu1 %v1501_v51 }
  0x7d   : > { %1330 = vmatpush3.bf16.msra.mxu0 %v1502_v52  ;;  %1352 = vmatpush3.bf16.msra.mxu1 %v1503_v53 }
  0x7e   : > { %1331 = vmatprep.subr.bf16.mxu0 %v1504_v54  ;;  %1353 = vmatprep.subr.bf16.mxu1 %v1505_v55 }
  0x81   : > { %1332 = vmatpush3.bf16.msra.mxu0 %v1506_v56  ;;  %1354 = vmatpush3.bf16.msra.mxu1 %v1507_v57 }
  0x82   : > { %1333 = vmatprep.subr.bf16.mxu0 %v1508_v58  ;;  %1355 = vmatprep.subr.bf16.mxu1 %v1509_v59 }
  0x85   : > { %1334 = vmatpush3.bf16.msra.mxu0 %v1510_v60  ;;  %1356 = vmatpush3.bf16.msra.mxu1 %v1511_v61 }
  0x86   : > { %1335 = vmatprep.subr.bf16.mxu0 %v1512_v62  ;;  %1357 = vmatprep.subr.bf16.mxu1 %v1513_v63 }
  0x89   : > { %1336 = vmatpush3.bf16.msra.mxu0 %v1514_v0  ;;  %1358 = vmatpush3.bf16.msra.mxu1 %v1515_v1 }
 0x13f   : > { %v658_v13 = vpop.f32.mrb[0].mxu0  ;;  %v699_v14 = vpop.f32.mrb[0].mxu1 }
 0x140   : > { %v659_v15 = vadd.f32 %v658_v13, %v447_v9  ;;  %v700_v16 = vadd.f32 %v699_v14, %v455_v10  ;;  %v660_v17 = vpop.f32.mrb[1].mxu0  ;;  %v701_v18 = vpop.f32.mrb[1].mxu1  ;;  %v1089_v13 = vstv %s408_s10  ;;  %s1653_s10 = smov [#allocation8]  }
 0x141   : > { %v661_v19 = vadd.f32 %v660_v17, %v451_v11  ;;  %v702_v20 = vadd.f32 %v701_v18, %v459_v12  ;;  %v662_v21 = vpop.f32.mrb[2].mxu0  ;;  %v703_v22 = vpop.f32.mrb[2].mxu1  ;;  %s1567_s11 = sshll.u32 %s1653_s10, 4  ;;  %s1568_s11 = int_to_ptr.vmem [resolvable:$false] %s1567_s11 }
 0x142   : > { %v706_v23 = vmul.f32 %v659_v15, %v659_v15  ;;  %v708_v24 = vmul.f32 %v700_v16, %v700_v16  ;;  %v663_v25 = vpop.f32.mrb[3].mxu0  ;;  %v704_v26 = vpop.f32.mrb[3].mxu1  ;;  %s1569_s13 = scalar_lea.vmem %s1568_s11, 256  ;;  %p1570_p12 = scmp.lt.s32.totalorder %s1889_s24, %s1568_s11 }
 0x143   : > { %v707_v27 = vmul.f32 %v661_v19, %v661_v19  ;;  %v709_v28 = vmul.f32 %v702_v20, %v702_v20  ;;  %p1571_p0 = scmp.lt.s32.totalorder %s1569_s13, %s1563_s30 }
 0x144   : > { %v710_v29 = vmul.f32 %v706_v23, %v659_v15  ;;  %v712_v30 = vmul.f32 %v708_v24, %v700_v16 }
 0x145   : > { %v711_v31 = vmul.f32 %v707_v27, %v661_v19  ;;  %v713_v32 = vmul.f32 %v709_v28, %v702_v20  ;;  %p1572_p1 = por %p1571_p0, %p1570_p12 }
 0x146   : > { %v714_v33 = vmul.f32 0.044715, %v710_v29  ;;  %v716_v34 = vmul.f32 0.044715, %v712_v30 }
 0x147   : > { %v715_v35 = vmul.f32 0.044715, %v711_v31  ;;  %v717_v36 = vmul.f32 0.044715, %v713_v32  ;;  %p1573_p2 = pnand %p1572_p1, %p1566_p11 }
 0x148   : > { %v718_v37 = vadd.f32 %v714_v33, %v659_v15  ;;  %v720_v38 = vadd.f32 %v716_v34, %v700_v16 }
 0x149   : > { %v719_v39 = vadd.f32 %v715_v35, %v661_v19  ;;  %v721_v40 = vadd.f32 %v717_v36, %v702_v20 }
 0x14a   : > { %v722_v41 = vmul.f32 0.7978846, %v718_v37  ;;  %v724_v42 = vmul.f32 0.7978846, %v720_v38 }
 0x14b   : > { %v723_v43 = vmul.f32 0.7978846, %v719_v39  ;;  %v725_v44 = vmul.f32 0.7978846, %v721_v40 }
 0x14c   : > { %1516 = vtanh.f32 %v722_v41 }
 0x14d   : > { %1518 = vtanh.f32 %v724_v42 }
 0x14e   : > { %1520 = vtanh.f32 %v723_v43 }
 0x14f   : > { %1522 = vtanh.f32 %v725_v44 }
 0x156   : > { %v1517_v45 = vpop.eup %1516 }
 0x157   : > { %v1519_v46 = vpop.eup %1518  ;;  %v730_v47 = vadd.f32 1.0, %v1517_v45 }
 0x158   : > { %v1521_v48 = vpop.eup %1520  ;;  %v732_v49 = vadd.f32 1.0, %v1519_v46 }
 0x159   : > { %v1523_v50 = vpop.eup %1522  ;;  %v731_v51 = vadd.f32 1.0, %v1521_v48  ;;  %v734_v52 = vmul.f32 0.5, %v730_v47 }
 0x15a   : > { %v733_v53 = vadd.f32 1.0, %v1523_v50  ;;  %v736_v54 = vmul.f32 0.5, %v732_v49 }
 0x15b   : > { %v735_v55 = vmul.f32 0.5, %v731_v51  ;;  %v738_v57 = vmul.f32 %v734_v52, %v659_v15 }
 0x15c   : > { %v737_v56 = vmul.f32 0.5, %v733_v53  ;;  %v740_v59 = vmul.f32 %v736_v54, %v700_v16 }
 0x15d   : > { %v739_v58 = vmul.f32 %v735_v55, %v661_v19  ;;  %v742_v63 = vpack.c.bf16 %v738_v57, %v738_v57 }
 0x15e   : > { %v741_v60 = vmul.f32 %v737_v56, %v702_v20  ;;  %v744_v0 = vpack.c.bf16 %v740_v59, %v740_v59 }
 0x15f   : > { %v743_v61 = vpack.c.bf16 %v739_v58, %v739_v58 }
 0x160   : > { %v745_v62 = vpack.c.bf16 %v741_v60, %v741_v60 }
 0x161   : > { %1041 = vmatprep.mubr.bf16.mxu0 %v743_v61 }
 0x162   : > { %1081 = vmatprep.mubr.bf16.mxu1 %v745_v62  ;;  %1042 = vmatmul.mubr.bf16.vlgmr.msra.gmra.mrb[4].mxu0 %v742_v63 }
 0x163   : > { %1082 = vmatmul.mubr.bf16.vlgmr.msra.gmra.mrb[4].mxu1 %v744_v0 }
 0x235   : > { %v1337_v1 = vpop.f32.mrb[4].mxu0 }
 0x236   : > { %v1359_v2 = vpop.f32.mrb[4].mxu1  ;;  %v1338_v4 = vpop.f32.mrb[5].mxu0 }
 0x237   : > { %v1339_v5 = vadd.f32 %v1338_v4, %v1337_v1  ;;  %v1360_v6 = vpop.f32.mrb[5].mxu1  ;;  %v1340_v7 = vpop.f32.mrb[6].mxu0 }
 0x238   : > { %v1361_v8 = vadd.f32 %v1360_v6, %v1359_v2  ;;  %v1362_v9 = vpop.f32.mrb[6].mxu1  ;;  %v1341_v10 = vpop.f32.mrb[7].mxu0 }
 0x239   : > { %v1044_v11 = vadd.f32 %v1339_v5, %v1282_v3  ;;  %v1363_v12 = vpop.f32.mrb[7].mxu1 }
 0x23b   : > { %v1084_v14 = vadd.f32 %v1361_v8, %v1044_v11 }
 0x23d   : > { %v1090_v15 = vmul.f32 %v1089_v13, %v1084_v14 }
 0x23f   : > { %1091 = vst [vmem:[%s371_s22] sm:$0xff] %v1090_v15 }
 0x240   : > { %1576 = shalt.err (!%p1573_p2)
}
 0x241   : > { %s1577_s9 = scalar_lea.hbm %s1887_s28, 128  ;;  %s1581_s20 = scalar_lea.hbm %s1941_s8, 512 }
 0x242   : > { %p1578_p3 = scmp.ne.s32.totalorder %s1887_s28, %s1577_s9  ;;  %p1582_p6 = scmp.lt.u32.totalorder %s1887_s28, %s1941_s8 }
 0x243   : > { %p1583_p7 = scmp.lt.u32.totalorder %s1581_s20, %s1577_s9  ;;  %p1585_p9 = scmp.lt.u32.totalorder %s1577_s9, %s1887_s28 }
 0x244   : > { %p1579_p4 = pnand %p1578_p3, %p1743_p13 }
 0x245   : > { %p1584_p8 = por %p1583_p7, %p1582_p6 }
 0x246   : > { %p1580_p5 = pneg %p1579_p4 }
 0x247   : > { %p1586_p10 = por %p1585_p9, %p1584_p8 }
 0x249   : > { %p1587_p11 = pnand %p1586_p10, %p1580_p5 }
 0x24b   : > { %1590 = shalt.err (!%p1587_p11)
}
 0x24c   : > { %1371 = dma.vmem_to_hbm [thread:$0]  (%p1743_p13), %s1889_s24, 128, %s1887_s28, %s1093_s29  }
 0x24d PF: > { %p1383_p12 = scmp.ge.s32.totalorder %s1647_s18, 2  ;;  %s1120_s26 = sand.u32 1, %s1627_s1  }
 0x24e   : > { %p1948_p0 = scmp.ne.s32.totalorder %s1944_s25, 0  ;;  %s1121_s27 = scalar_lea.sflag [#allocation6], %s1120_s26 }
 0x250   : > { %p1378_p1 = pnand %p1383_p12, %p1948_p0 }
 0x252   : > { %1622 = dma.done.wait (!%p1378_p1), %s1121_s27, 128  }
 0x253   : > { %1624 = vsyncadd (!%p1378_p1), %s1121_s27, 4294967168  ;;  %s32_s18 = sadd.s32 1, %s1647_s18   ;;  %s1949_s1 = smov %s1631_s14 }
 0x254   : > { %p29_p2 = scmp.ge.s32.totalorder %s32_s18, 6   ;;  %s1950_s14 = smov %s1635_s15 }
 0x255   : > { %s1951_s15 = smov %s1777_s12  ;;  %s1952_s16 = smov %s1643_s17 }
 0x256   : > { %s1953_s17 = smov %s1955_s21  ;;  %31 = sbr.rel (!%p29_p2) target bundleno = 30 (0x1e), region = 96 }
 0x25d   :  { %1126 = vsyncpa [#allocation6], 1 }
 0x25e   :  { %1128 = vsyncpa [#allocation6 + $0x1], 1 }
 0x25f   :  { %1129 = vsyncpa [#allocation7], 1 }
 0x260   :  { %1131 = vsyncpa [#allocation7 + $0x1], 1 }

</bundles_post_ra>
